<compile_context>
chip_gen: v5e
topology: v5e:2x2
jax: 0.10.0
libtpu: 0.0.40
codegen_flags: <defaults>
</compile_context>

<pallas_src>
import functools
import inspect
import math

import jax
import jax.numpy as jnp
from jax.experimental import pallas as pl
from jax.experimental.pallas import tpu as pltpu


def _gelu_tanh(x):
    # GELU(approximate='tanh')
    c = 0.7978845608028654  # sqrt(2/pi)
    return 0.5 * x * (1.0 + jnp.tanh(c * (x + 0.044715 * x * x * x)))


def _round_up(x, m):
    return (x + m - 1) // m * m


def _supports_single_buffering():
    # One-time capability check (replaces the old bare try/except fallback).
    if not hasattr(pl, "Buffered"):
        return False
    try:
        return "pipeline_mode" in inspect.signature(pl.BlockSpec).parameters
    except (TypeError, ValueError):
        return False


_SINGLE_BUFFER_WEIGHTS = _supports_single_buffering()


# ----------------------------- Pallas kernel --------------------------------
def cfm_kernel(mel_ref, enc_ref, f0_ref, bj1b_ref,
               wp_ref, bp_ref, we1_ref, be1_ref, wf1_ref, bf1_ref,
               we2_ref, wf2_ref, wj1_ref, wj2_ref, bj2_ref,
               out_ref, *, bf16_gelu):
    mel = mel_ref[0]                                  # [M, Tt]  bf16
    enc = enc_ref[0]                                  # [M, Tt]  bf16
    f0 = f0_ref[0]                                    # [1, Tt]  f32

    # prenet: Conv1d(M->C, k=1) + GELU(tanh); kept f32 (exact pass-through)
    xh = _gelu_tanh(
        jnp.dot(wp_ref[...], mel, preferred_element_type=jnp.float32)
        + bp_ref[...])                                # [C, Tt]  f32

    # encoding_ffn layer 1 (MXU) and f0_ffn layer 1 (rank-1 -> VPU only)
    e1 = (jnp.dot(we1_ref[...], enc, preferred_element_type=jnp.float32)
          + be1_ref[...])                             # [4C, Tt] f32
    f1 = wf1_ref[...] * f0 + bf1_ref[...]             # [4C, Tt] f32
    if bf16_gelu:
        # bf16 GELU keeps the single EUP slot from saturating (v6e/v7x);
        # both branches are cast to bf16 for the next MXU pass anyway.
        eh = _gelu_tanh(e1.astype(jnp.bfloat16))
        fh = _gelu_tanh(f1.astype(jnp.bfloat16))
    else:
        eh = _gelu_tanh(e1).astype(jnp.bfloat16)
        fh = _gelu_tanh(f1).astype(jnp.bfloat16)

    # encoding_ffn / f0_ffn second layers; be2 + bf2 + step_ffn(timestep) are
    # folded into the per-batch projection bias bj1b (see wrapper).
    h = (xh
         + jnp.dot(we2_ref[...], eh, preferred_element_type=jnp.float32)
         + jnp.dot(wf2_ref[...], fh, preferred_element_type=jnp.float32))

    # TODO(synk): FFT_Block transformer stack (self/cross attention + FFN) is
    # not implemented here - its class definition was not provided.

    # projection: Conv1d(C->C,k=1) + GELU(tanh), Conv1d(C->M,k=1) (mel padded
    # to a lane-dense multiple of 128 rows)
    p = _gelu_tanh(
        jnp.dot(wj1_ref[...], h.astype(jnp.bfloat16),
                preferred_element_type=jnp.float32)
        + bj1b_ref[0])                                # [C, Tt]  f32
    out = (jnp.dot(wj2_ref[...], p.astype(jnp.bfloat16),
                   preferred_element_type=jnp.float32)
           + bj2_ref[...])                            # [Mpad, Tt] f32
    out_ref[0] = out.astype(out_ref.dtype)            # bf16 store (NCT layout)


# --------------------------- step embedding FFN ------------------------------
def _step_ffn(timesteps, params):
    # Step_Embedding + Linear(C->4C) + GELU(tanh) + Linear(4C->C).
    # Per-batch only -> computed once in the wrapper, not per grid step.
    arg = timesteps[:, None] * params["div_term"][None, :]
    se = jnp.concatenate([jnp.sin(arg), jnp.cos(arg)], axis=-1)     # [B, C]
    h = _gelu_tanh(se @ params["ws1"].T + params["bs1"])
    return h @ params["ws2"].T + params["bs2"]                      # [B, C]


# ------------------------------ JAX wrapper ----------------------------------
def cfm_forward(noised_mels, encodings, f0s, timesteps, params, *,
                t_tile=512, bf16_gelu=True):
    """
    noised_mels: [B, M, T]   (PyTorch NCT layout)
    encodings:   [B, M, T]
    f0s:         [B, T]
    timesteps:   [B]
    returns:     [B, M, T]   float32
    """
    B, M, T = noised_mels.shape
    C = params["wp"].shape[0]                    # torch layout: [out, in]
    m_pad = _round_up(M, 128)                    # lane-dense projection rows
    t_tile = max(128, _round_up(min(t_tile, _round_up(T, 128)), 128))
    t_pad = _round_up(T, t_tile)
    n_t = t_pad // t_tile

    # Inputs stay in NCT layout: only pad T and cast to bf16 (no transpose /
    # concat round trips through HBM).
    mel_p = jnp.pad(noised_mels, ((0, 0), (0, 0), (0, t_pad - T))).astype(jnp.bfloat16)
    enc_p = jnp.pad(encodings, ((0, 0), (0, 0), (0, t_pad - T))).astype(jnp.bfloat16)
    f0_p = jnp.pad(f0s, ((0, 0), (0, t_pad - T)))[:, None, :]       # [B,1,Tp] f32

    # Fold step_ffn + encoding/f0 second-layer biases through the projection's
    # first conv:  gelu(Wj1 @ (h + c) + bj1) == gelu(Wj1 @ h + (bj1 + Wj1 @ c))
    s = _step_ffn(timesteps, params)                                # [B, C]
    cvec = s + params["be2"][None, :] + params["bf2"][None, :]      # [B, C]
    bj1b = (params["bj1"][None, :] + cvec @ params["wj1"].T)[:, :, None]  # [B,C,1]

    # Weights: bf16 MXU operands, f32 biases. Torch [out, in] layout is kept.
    wp = params["wp"].astype(jnp.bfloat16)                          # [C, M]
    bp = params["bp"][:, None]                                      # [C, 1]
    we1 = params["we1"].astype(jnp.bfloat16)                        # [4C, M]
    be1 = params["be1"][:, None]                                    # [4C, 1]
    wf1 = params["wf1"]                                             # [4C, 1] f32 (VPU)
    bf1 = params["bf1"][:, None]                                    # [4C, 1]
    we2 = params["we2"].astype(jnp.bfloat16)                        # [C, 4C]
    wf2 = params["wf2"].astype(jnp.bfloat16)                        # [C, 4C]
    wj1 = params["wj1"].astype(jnp.bfloat16)                        # [C, C]
    wj2p = jnp.pad(params["wj2"], ((0, m_pad - M), (0, 0))).astype(jnp.bfloat16)
    bj2p = jnp.pad(params["bj2"], (0, m_pad - M))[:, None]          # [m_pad, 1]
    weights = (wp, bp, we1, be1, wf1, bf1, we2, wf2, wj1, wj2p, bj2p)

    def const_spec(arr):
        nd = arr.ndim
        kw = {"pipeline_mode": pl.Buffered(1)} if _SINGLE_BUFFER_WEIGHTS else {}
        return pl.BlockSpec(arr.shape, lambda ti, b, _n=nd: (0,) * _n, **kw)

    in_specs = [
        pl.BlockSpec((1, M, t_tile), lambda ti, b: (b, 0, ti)),      # mel
        pl.BlockSpec((1, M, t_tile), lambda ti, b: (b, 0, ti)),      # enc
        pl.BlockSpec((1, 1, t_tile), lambda ti, b: (b, 0, ti)),      # f0
        pl.BlockSpec((1, C, 1), lambda ti, b: (b, 0, 0)),            # per-batch bias
    ] + [const_spec(w) for w in weights]

    out = pl.pallas_call(
        functools.partial(cfm_kernel, bf16_gelu=bf16_gelu),
        out_shape=jax.ShapeDtypeStruct((B, m_pad, t_pad), jnp.bfloat16),
        grid_spec=pltpu.PrefetchScalarGridSpec(
            num_scalar_prefetch=0,
            grid=(n_t, B),                       # larger (time) axis first
            in_specs=in_specs,
            out_specs=pl.BlockSpec((1, m_pad, t_tile),
                                   lambda ti, b: (b, 0, ti)),
        ),
        compiler_params=pltpu.CompilerParams(
            dimension_semantics=("parallel", "parallel"),
            # Actual footprint is well below 32 MiB; stay within the scoped
            # default so it is also safe on v7x's 64 MiB physical VMEM.
            vmem_limit_bytes=32 * 1024 * 1024,
        ),
    )(mel_p, enc_p, f0_p, bj1b, *weights)

    # Output is already NCT: drop padding, cast to f32 only at the end.
    return out[:, :M, :T].astype(jnp.float32)


# --------------------------- parameter construction --------------------------
def make_params(key, n_mel, size):
    C, M = size, n_mel
    half = C // 2
    div_term = jnp.exp(
        jnp.arange(half, dtype=jnp.float32) * -(math.log(10000.0) / max(half - 1, 1))
    )
    # PyTorch layouts: Conv1d(k=1)/Linear weights are [out, in]; biases [out].
    shapes = {
        "wp": (C, M), "bp": (C,),
        "we1": (4 * C, M), "be1": (4 * C,),
        "we2": (C, 4 * C), "be2": (C,),
        "wf1": (4 * C, 1), "bf1": (4 * C,),
        "wf2": (C, 4 * C), "bf2": (C,),
        "ws1": (4 * C, C), "bs1": (4 * C,),
        "ws2": (C, 4 * C), "bs2": (C,),
        "wj1": (C, C), "bj1": (C,),
        "wj2": (M, C), "bj2": (M,),
    }
    params = {}
    keys = jax.random.split(key, len(shapes))
    for k, (name, shp) in zip(keys, sorted(shapes.items())):
        fan_in = shp[-1] if len(shp) > 1 else shp[0]
        params[name] = (
            jax.random.normal(k, shp, dtype=jnp.float32) / math.sqrt(max(fan_in, 1))
        )
    params["div_term"] = div_term
    return params


# ------------------------------ pure-JAX reference ---------------------------
def ref_forward(noised_mels, encodings, f0s, timesteps, params):
    mel = jnp.transpose(noised_mels, (0, 2, 1))
    enc = jnp.transpose(encodings, (0, 2, 1))
    x = _gelu_tanh(mel @ params["wp"].T + params["bp"])
    e = (_gelu_tanh(enc @ params["we1"].T + params["be1"]) @ params["we2"].T
         + params["be2"])
    f = (_gelu_tanh(f0s[:, :, None] @ params["wf1"].T + params["bf1"])
         @ params["wf2"].T + params["bf2"])
    s = _step_ffn(timesteps, params)
    h = x + e + f + s[:, None, :]
    out = (_gelu_tanh(h @ params["wj1"].T + params["bj1"]) @ params["wj2"].T
           + params["bj2"])
    return jnp.transpose(out, (0, 2, 1))


if __name__ == "__main__":
    B, N_MEL, SIZE, T = 2, 16, 32, 40

    key = jax.random.PRNGKey(0)
    k_p, k_mel, k_enc, k_f0, k_t = jax.random.split(key, 5)
    params = make_params(k_p, N_MEL, SIZE)

    noised_mels = jax.random.normal(k_mel, (B, N_MEL, T), dtype=jnp.float32)
    encodings = jax.random.normal(k_enc, (B, N_MEL, T), dtype=jnp.float32)
    f0s = jax.random.uniform(k_f0, (B, T), dtype=jnp.float32) * 200.0
    timesteps = jax.random.uniform(k_t, (B,), dtype=jnp.float32)

    fwd = jax.jit(cfm_forward)
    out = jax.block_until_ready(fwd(noised_mels, encodings, f0s, timesteps, params))

    ref = ref_forward(noised_mels, encodings, f0s, timesteps, params)
    assert out.shape == (B, N_MEL, T)
    rel_err = float(jnp.max(jnp.abs(out - ref)) / (jnp.max(jnp.abs(ref)) + 1e-6))
    # bf16 MXU operands / bf16 GELU / bf16 output store vs f32 reference:
    # a couple of percent max-normalized deviation is expected.
    assert rel_err < 4e-2, f"mismatch vs JAX reference: rel_err={rel_err}"

    print("KERNEL_OK")
</pallas_src>

<mosaic_0001>
module attributes {stable_mosaic.version = 11 : i64} {
  func.func @cfm_kernel(%arg0: i32, %arg1: i32, %arg2: memref<1x16x128xbf16, #tpu.memory_space<vmem>>, %arg3: memref<1x16x128xbf16, #tpu.memory_space<vmem>>, %arg4: memref<1x1x128xf32, #tpu.memory_space<vmem>>, %arg5: memref<1x32x1xf32, #tpu.memory_space<vmem>>, %arg6: memref<32x16xbf16, #tpu.memory_space<vmem>>, %arg7: memref<32x1xf32, #tpu.memory_space<vmem>>, %arg8: memref<128x16xbf16, #tpu.memory_space<vmem>>, %arg9: memref<128x1xf32, #tpu.memory_space<vmem>>, %arg10: memref<128x1xf32, #tpu.memory_space<vmem>>, %arg11: memref<128x1xf32, #tpu.memory_space<vmem>>, %arg12: memref<32x128xbf16, #tpu.memory_space<vmem>>, %arg13: memref<32x128xbf16, #tpu.memory_space<vmem>>, %arg14: memref<32x32xbf16, #tpu.memory_space<vmem>>, %arg15: memref<128x32xbf16, #tpu.memory_space<vmem>>, %arg16: memref<128x1xf32, #tpu.memory_space<vmem>>, %arg17: memref<1x128x128xbf16, #tpu.memory_space<vmem>>) attributes {dimension_semantics = [#tpu.dimension_semantics<parallel>, #tpu.dimension_semantics<parallel>], iteration_bounds = array<i64: 1, 2>, scalar_prefetch = 0 : i64, scratch_operands = 0 : i64, tpu.core_type = #tpu.core_type<tc>, window_params = [{transform_indices = @transform_0, window_bounds = array<i64: 1, 16, 128>}, {transform_indices = @transform_1, window_bounds = array<i64: 1, 16, 128>}, {transform_indices = @transform_2, window_bounds = array<i64: 1, 1, 128>}, {transform_indices = @transform_3, window_bounds = array<i64: 1, 32, 1>}, {pipeline_mode = #tpu.pipeline_mode<synchronous>, transform_indices = @transform_4, window_bounds = array<i64: 32, 16>}, {pipeline_mode = #tpu.pipeline_mode<synchronous>, transform_indices = @transform_5, window_bounds = array<i64: 32, 1>}, {pipeline_mode = #tpu.pipeline_mode<synchronous>, transform_indices = @transform_6, window_bounds = array<i64: 128, 16>}, {pipeline_mode = #tpu.pipeline_mode<synchronous>, transform_indices = @transform_7, window_bounds = array<i64: 128, 1>}, {pipeline_mode = #tpu.pipeline_mode<synchronous>, transform_indices = @transform_8, window_bounds = array<i64: 128, 1>}, {pipeline_mode = #tpu.pipeline_mode<synchronous>, transform_indices = @transform_9, window_bounds = array<i64: 128, 1>}, {pipeline_mode = #tpu.pipeline_mode<synchronous>, transform_indices = @transform_10, window_bounds = array<i64: 32, 128>}, {pipeline_mode = #tpu.pipeline_mode<synchronous>, transform_indices = @transform_11, window_bounds = array<i64: 32, 128>}, {pipeline_mode = #tpu.pipeline_mode<synchronous>, transform_indices = @transform_12, window_bounds = array<i64: 32, 32>}, {pipeline_mode = #tpu.pipeline_mode<synchronous>, transform_indices = @transform_13, window_bounds = array<i64: 128, 32>}, {pipeline_mode = #tpu.pipeline_mode<synchronous>, transform_indices = @transform_14, window_bounds = array<i64: 128, 1>}, {transform_indices = @transform_15, window_bounds = array<i64: 1, 128, 128>}]} {
    %c0 = arith.constant 0 : index
    %c0_0 = arith.constant 0 : index
    %c0_1 = arith.constant 0 : index
    %0 = vector.load %arg2[%c0, %c0_0, %c0_1] : memref<1x16x128xbf16, #tpu.memory_space<vmem>>, vector<1x16x128xbf16>
    %1 = vector.shape_cast %0 : vector<1x16x128xbf16> to vector<16x128xbf16>
    %c0_2 = arith.constant 0 : index
    %c0_3 = arith.constant 0 : index
    %c0_4 = arith.constant 0 : index
    %2 = vector.load %arg3[%c0_2, %c0_3, %c0_4] : memref<1x16x128xbf16, #tpu.memory_space<vmem>>, vector<1x16x128xbf16>
    %3 = vector.shape_cast %2 : vector<1x16x128xbf16> to vector<16x128xbf16>
    %c0_5 = arith.constant 0 : index
    %c0_6 = arith.constant 0 : index
    %c0_7 = arith.constant 0 : index
    %4 = vector.load %arg4[%c0_5, %c0_6, %c0_7] : memref<1x1x128xf32, #tpu.memory_space<vmem>>, vector<1x1x128xf32>
    %5 = vector.shape_cast %4 : vector<1x1x128xf32> to vector<1x128xf32>
    %c0_8 = arith.constant 0 : index
    %c0_9 = arith.constant 0 : index
    %6 = vector.load %arg6[%c0_8, %c0_9] : memref<32x16xbf16, #tpu.memory_space<vmem>>, vector<32x16xbf16>
    %cst = arith.constant dense<0.000000e+00> : vector<32x128xf32>
    %7 = tpu.matmul %6, %1, %cst {dimension_numbers = #tpu.dot_dimension_numbers<[1], [0], [0], [1], [0, 0, 1, 1], [], []>} : vector<32x16xbf16>, vector<16x128xbf16>, vector<32x128xf32> -> vector<32x128xf32>
    %c0_10 = arith.constant 0 : index
    %c0_11 = arith.constant 0 : index
    %8 = vector.load %arg7[%c0_10, %c0_11] : memref<32x1xf32, #tpu.memory_space<vmem>>, vector<32x1xf32>
    %9 = vector.broadcast %8 : vector<32x1xf32> to vector<32x128xf32>
    %10 = arith.addf %7, %9 : vector<32x128xf32>
    %cst_12 = arith.constant 5.000000e-01 : f32
    %11 = vector.broadcast %cst_12 : f32 to vector<32x128xf32>
    %12 = arith.mulf %11, %10 : vector<32x128xf32>
    %cst_13 = arith.constant 4.471500e-02 : f32
    %13 = vector.broadcast %cst_13 : f32 to vector<32x128xf32>
    %14 = arith.mulf %13, %10 : vector<32x128xf32>
    %15 = arith.mulf %14, %10 : vector<32x128xf32>
    %16 = arith.mulf %15, %10 : vector<32x128xf32>
    %17 = arith.addf %10, %16 : vector<32x128xf32>
    %cst_14 = arith.constant 0.797884583 : f32
    %18 = vector.broadcast %cst_14 : f32 to vector<32x128xf32>
    %19 = arith.mulf %18, %17 : vector<32x128xf32>
    %20 = math.tanh %19 : vector<32x128xf32>
    %cst_15 = arith.constant 1.000000e+00 : f32
    %21 = vector.broadcast %cst_15 : f32 to vector<32x128xf32>
    %22 = arith.addf %21, %20 : vector<32x128xf32>
    %23 = arith.mulf %12, %22 : vector<32x128xf32>
    %c0_16 = arith.constant 0 : index
    %c0_17 = arith.constant 0 : index
    %24 = vector.load %arg8[%c0_16, %c0_17] : memref<128x16xbf16, #tpu.memory_space<vmem>>, vector<128x16xbf16>
    %cst_18 = arith.constant dense<0.000000e+00> : vector<128x128xf32>
    %25 = tpu.matmul %24, %3, %cst_18 {dimension_numbers = #tpu.dot_dimension_numbers<[1], [0], [0], [1], [0, 0, 1, 1], [], []>} : vector<128x16xbf16>, vector<16x128xbf16>, vector<128x128xf32> -> vector<128x128xf32>
    %c0_19 = arith.constant 0 : index
    %c0_20 = arith.constant 0 : index
    %26 = vector.load %arg9[%c0_19, %c0_20] : memref<128x1xf32, #tpu.memory_space<vmem>>, vector<128x1xf32>
    %27 = vector.broadcast %26 : vector<128x1xf32> to vector<128x128xf32>
    %28 = arith.addf %25, %27 : vector<128x128xf32>
    %c0_21 = arith.constant 0 : index
    %c0_22 = arith.constant 0 : index
    %29 = vector.load %arg10[%c0_21, %c0_22] : memref<128x1xf32, #tpu.memory_space<vmem>>, vector<128x1xf32>
    %30 = vector.broadcast %29 : vector<128x1xf32> to vector<128x128xf32>
    %31 = vector.broadcast %5 : vector<1x128xf32> to vector<128x128xf32>
    %32 = arith.mulf %30, %31 : vector<128x128xf32>
    %c0_23 = arith.constant 0 : index
    %c0_24 = arith.constant 0 : index
    %33 = vector.load %arg11[%c0_23, %c0_24] : memref<128x1xf32, #tpu.memory_space<vmem>>, vector<128x1xf32>
    %34 = vector.broadcast %33 : vector<128x1xf32> to vector<128x128xf32>
    %35 = arith.addf %32, %34 : vector<128x128xf32>
    %36 = arith.truncf %28 : vector<128x128xf32> to vector<128x128xbf16>
    %cst_25 = arith.constant 5.000000e-01 : bf16
    %37 = vector.broadcast %cst_25 : bf16 to vector<128x128xbf16>
    %38 = arith.mulf %37, %36 : vector<128x128xbf16>
    %cst_26 = arith.constant 4.467770e-02 : bf16
    %39 = vector.broadcast %cst_26 : bf16 to vector<128x128xbf16>
    %40 = arith.mulf %39, %36 : vector<128x128xbf16>
    %41 = arith.mulf %40, %36 : vector<128x128xbf16>
    %42 = arith.mulf %41, %36 : vector<128x128xbf16>
    %43 = arith.addf %36, %42 : vector<128x128xbf16>
    %cst_27 = arith.constant 7.968750e-01 : bf16
    %44 = vector.broadcast %cst_27 : bf16 to vector<128x128xbf16>
    %45 = arith.mulf %44, %43 : vector<128x128xbf16>
    %46 = math.tanh %45 : vector<128x128xbf16>
    %cst_28 = arith.constant 1.000000e+00 : bf16
    %47 = vector.broadcast %cst_28 : bf16 to vector<128x128xbf16>
    %48 = arith.addf %47, %46 : vector<128x128xbf16>
    %49 = arith.mulf %38, %48 : vector<128x128xbf16>
    %50 = arith.truncf %35 : vector<128x128xf32> to vector<128x128xbf16>
    %cst_29 = arith.constant 5.000000e-01 : bf16
    %51 = vector.broadcast %cst_29 : bf16 to vector<128x128xbf16>
    %52 = arith.mulf %51, %50 : vector<128x128xbf16>
    %cst_30 = arith.constant 4.467770e-02 : bf16
    %53 = vector.broadcast %cst_30 : bf16 to vector<128x128xbf16>
    %54 = arith.mulf %53, %50 : vector<128x128xbf16>
    %55 = arith.mulf %54, %50 : vector<128x128xbf16>
    %56 = arith.mulf %55, %50 : vector<128x128xbf16>
    %57 = arith.addf %50, %56 : vector<128x128xbf16>
    %cst_31 = arith.constant 7.968750e-01 : bf16
    %58 = vector.broadcast %cst_31 : bf16 to vector<128x128xbf16>
    %59 = arith.mulf %58, %57 : vector<128x128xbf16>
    %60 = math.tanh %59 : vector<128x128xbf16>
    %cst_32 = arith.constant 1.000000e+00 : bf16
    %61 = vector.broadcast %cst_32 : bf16 to vector<128x128xbf16>
    %62 = arith.addf %61, %60 : vector<128x128xbf16>
    %63 = arith.mulf %52, %62 : vector<128x128xbf16>
    %c0_33 = arith.constant 0 : index
    %c0_34 = arith.constant 0 : index
    %64 = vector.load %arg12[%c0_33, %c0_34] : memref<32x128xbf16, #tpu.memory_space<vmem>>, vector<32x128xbf16>
    %cst_35 = arith.constant dense<0.000000e+00> : vector<32x128xf32>
    %65 = tpu.matmul %64, %49, %cst_35 {dimension_numbers = #tpu.dot_dimension_numbers<[1], [0], [0], [1], [0, 0, 1, 1], [], []>} : vector<32x128xbf16>, vector<128x128xbf16>, vector<32x128xf32> -> vector<32x128xf32>
    %66 = arith.addf %23, %65 : vector<32x128xf32>
    %c0_36 = arith.constant 0 : index
    %c0_37 = arith.constant 0 : index
    %67 = vector.load %arg13[%c0_36, %c0_37] : memref<32x128xbf16, #tpu.memory_space<vmem>>, vector<32x128xbf16>
    %cst_38 = arith.constant dense<0.000000e+00> : vector<32x128xf32>
    %68 = tpu.matmul %67, %63, %cst_38 {dimension_numbers = #tpu.dot_dimension_numbers<[1], [0], [0], [1], [0, 0, 1, 1], [], []>} : vector<32x128xbf16>, vector<128x128xbf16>, vector<32x128xf32> -> vector<32x128xf32>
    %69 = arith.addf %66, %68 : vector<32x128xf32>
    %c0_39 = arith.constant 0 : index
    %c0_40 = arith.constant 0 : index
    %70 = vector.load %arg14[%c0_39, %c0_40] : memref<32x32xbf16, #tpu.memory_space<vmem>>, vector<32x32xbf16>
    %71 = arith.truncf %69 : vector<32x128xf32> to vector<32x128xbf16>
    %cst_41 = arith.constant dense<0.000000e+00> : vector<32x128xf32>
    %72 = tpu.matmul %70, %71, %cst_41 {dimension_numbers = #tpu.dot_dimension_numbers<[1], [0], [0], [1], [0, 0, 1, 1], [], []>} : vector<32x32xbf16>, vector<32x128xbf16>, vector<32x128xf32> -> vector<32x128xf32>
    %c0_42 = arith.constant 0 : index
    %c0_43 = arith.constant 0 : index
    %c0_44 = arith.constant 0 : index
    %73 = vector.load %arg5[%c0_42, %c0_43, %c0_44] : memref<1x32x1xf32, #tpu.memory_space<vmem>>, vector<1x32x1xf32>
    %74 = vector.shape_cast %73 : vector<1x32x1xf32> to vector<32x1xf32>
    %75 = vector.broadcast %74 : vector<32x1xf32> to vector<32x128xf32>
    %76 = arith.addf %72, %75 : vector<32x128xf32>
    %cst_45 = arith.constant 5.000000e-01 : f32
    %77 = vector.broadcast %cst_45 : f32 to vector<32x128xf32>
    %78 = arith.mulf %77, %76 : vector<32x128xf32>
    %cst_46 = arith.constant 4.471500e-02 : f32
    %79 = vector.broadcast %cst_46 : f32 to vector<32x128xf32>
    %80 = arith.mulf %79, %76 : vector<32x128xf32>
    %81 = arith.mulf %80, %76 : vector<32x128xf32>
    %82 = arith.mulf %81, %76 : vector<32x128xf32>
    %83 = arith.addf %76, %82 : vector<32x128xf32>
    %cst_47 = arith.constant 0.797884583 : f32
    %84 = vector.broadcast %cst_47 : f32 to vector<32x128xf32>
    %85 = arith.mulf %84, %83 : vector<32x128xf32>
    %86 = math.tanh %85 : vector<32x128xf32>
    %cst_48 = arith.constant 1.000000e+00 : f32
    %87 = vector.broadcast %cst_48 : f32 to vector<32x128xf32>
    %88 = arith.addf %87, %86 : vector<32x128xf32>
    %89 = arith.mulf %78, %88 : vector<32x128xf32>
    %c0_49 = arith.constant 0 : index
    %c0_50 = arith.constant 0 : index
    %90 = vector.load %arg15[%c0_49, %c0_50] : memref<128x32xbf16, #tpu.memory_space<vmem>>, vector<128x32xbf16>
    %91 = arith.truncf %89 : vector<32x128xf32> to vector<32x128xbf16>
    %cst_51 = arith.constant dense<0.000000e+00> : vector<128x128xf32>
    %92 = tpu.matmul %90, %91, %cst_51 {dimension_numbers = #tpu.dot_dimension_numbers<[1], [0], [0], [1], [0, 0, 1, 1], [], []>} : vector<128x32xbf16>, vector<32x128xbf16>, vector<128x128xf32> -> vector<128x128xf32>
    %c0_52 = arith.constant 0 : index
    %c0_53 = arith.constant 0 : index
    %93 = vector.load %arg16[%c0_52, %c0_53] : memref<128x1xf32, #tpu.memory_space<vmem>>, vector<128x1xf32>
    %94 = vector.broadcast %93 : vector<128x1xf32> to vector<128x128xf32>
    %95 = arith.addf %92, %94 : vector<128x128xf32>
    %96 = arith.truncf %95 : vector<128x128xf32> to vector<128x128xbf16>
    %c0_54 = arith.constant 0 : index
    %c0_55 = arith.constant 0 : index
    %c0_56 = arith.constant 0 : index
    %97 = vector.load %arg17[%c0_54, %c0_55, %c0_56] : memref<1x128x128xbf16, #tpu.memory_space<vmem>>, vector<1x128x128xbf16>
    %98 = vector.shape_cast %97 : vector<1x128x128xbf16> to vector<128x128xbf16>
    %99 = vector.shape_cast %96 : vector<128x128xbf16> to vector<1x128x128xbf16>
    tpu.vector_store %arg17[%c0_54, %c0_55, %c0_56], %99 {strides = array<i32>} : memref<1x128x128xbf16, #tpu.memory_space<vmem>>, vector<1x128x128xbf16>,
    return
  }
  func.func @transform_0(%arg0: i32, %arg1: i32) -> (i32, i32, i32) {
    %c0_i32 = arith.constant 0 : i32
    %c0_i32_0 = arith.constant 0 : i32
    return %arg1, %c0_i32, %arg0 : i32, i32, i32
  }
  func.func @transform_1(%arg0: i32, %arg1: i32) -> (i32, i32, i32) {
    %c0_i32 = arith.constant 0 : i32
    %c0_i32_0 = arith.constant 0 : i32
    return %arg1, %c0_i32, %arg0 : i32, i32, i32
  }
  func.func @transform_2(%arg0: i32, %arg1: i32) -> (i32, i32, i32) {
    %c0_i32 = arith.constant 0 : i32
    %c0_i32_0 = arith.constant 0 : i32
    return %arg1, %c0_i32, %arg0 : i32, i32, i32
  }
  func.func @transform_3(%arg0: i32, %arg1: i32) -> (i32, i32, i32) {
    %c0_i32 = arith.constant 0 : i32
    %c0_i32_0 = arith.constant 0 : i32
    %c0_i32_1 = arith.constant 0 : i32
    return %arg1, %c0_i32, %c0_i32_0 : i32, i32, i32
  }
  func.func @transform_4(%arg0: i32, %arg1: i32) -> (i32, i32) {
    %c0_i32 = arith.constant 0 : i32
    %c0_i32_0 = arith.constant 0 : i32
    %c0_i32_1 = arith.constant 0 : i32
    return %c0_i32, %c0_i32_0 : i32, i32
  }
  func.func @transform_5(%arg0: i32, %arg1: i32) -> (i32, i32) {
    %c0_i32 = arith.constant 0 : i32
    %c0_i32_0 = arith.constant 0 : i32
    %c0_i32_1 = arith.constant 0 : i32
    return %c0_i32, %c0_i32_0 : i32, i32
  }
  func.func @transform_6(%arg0: i32, %arg1: i32) -> (i32, i32) {
    %c0_i32 = arith.constant 0 : i32
    %c0_i32_0 = arith.constant 0 : i32
    %c0_i32_1 = arith.constant 0 : i32
    return %c0_i32, %c0_i32_0 : i32, i32
  }
  func.func @transform_7(%arg0: i32, %arg1: i32) -> (i32, i32) {
    %c0_i32 = arith.constant 0 : i32
    %c0_i32_0 = arith.constant 0 : i32
    %c0_i32_1 = arith.constant 0 : i32
    return %c0_i32, %c0_i32_0 : i32, i32
  }
  func.func @transform_8(%arg0: i32, %arg1: i32) -> (i32, i32) {
    %c0_i32 = arith.constant 0 : i32
    %c0_i32_0 = arith.constant 0 : i32
    %c0_i32_1 = arith.constant 0 : i32
    return %c0_i32, %c0_i32_0 : i32, i32
  }
  func.func @transform_9(%arg0: i32, %arg1: i32) -> (i32, i32) {
    %c0_i32 = arith.constant 0 : i32
    %c0_i32_0 = arith.constant 0 : i32
    %c0_i32_1 = arith.constant 0 : i32
    return %c0_i32, %c0_i32_0 : i32, i32
  }
  func.func @transform_10(%arg0: i32, %arg1: i32) -> (i32, i32) {
    %c0_i32 = arith.constant 0 : i32
    %c0_i32_0 = arith.constant 0 : i32
    %c0_i32_1 = arith.constant 0 : i32
    return %c0_i32, %c0_i32_0 : i32, i32
  }
  func.func @transform_11(%arg0: i32, %arg1: i32) -> (i32, i32) {
    %c0_i32 = arith.constant 0 : i32
    %c0_i32_0 = arith.constant 0 : i32
    %c0_i32_1 = arith.constant 0 : i32
    return %c0_i32, %c0_i32_0 : i32, i32
  }
  func.func @transform_12(%arg0: i32, %arg1: i32) -> (i32, i32) {
    %c0_i32 = arith.constant 0 : i32
    %c0_i32_0 = arith.constant 0 : i32
    %c0_i32_1 = arith.constant 0 : i32
    return %c0_i32, %c0_i32_0 : i32, i32
  }
  func.func @transform_13(%arg0: i32, %arg1: i32) -> (i32, i32) {
    %c0_i32 = arith.constant 0 : i32
    %c0_i32_0 = arith.constant 0 : i32
    %c0_i32_1 = arith.constant 0 : i32
    return %c0_i32, %c0_i32_0 : i32, i32
  }
  func.func @transform_14(%arg0: i32, %arg1: i32) -> (i32, i32) {
    %c0_i32 = arith.constant 0 : i32
    %c0_i32_0 = arith.constant 0 : i32
    %c0_i32_1 = arith.constant 0 : i32
    return %c0_i32, %c0_i32_0 : i32, i32
  }
  func.func @transform_15(%arg0: i32, %arg1: i32) -> (i32, i32, i32) {
    %c0_i32 = arith.constant 0 : i32
    %c0_i32_0 = arith.constant 0 : i32
    return %arg1, %c0_i32, %arg0 : i32, i32, i32
  }
}

</mosaic_0001>

<bundles_post_ra>
// kernel: cfm_forward.1
= control target key start
LH: loop header
LB: loop body
LE: loop exit
PB: predicated region body
PF: predicated region fallthrough
CT: control target
= control target key end

     0   :  { %s3057_s18 = smov 0   ;;  %s3059_s19 = smov 0   ;;  %s3903_s0 = inlined_call_operand.vmem [shape: bf16[2,16,128], index: 0, kind: input, shape index: {}]   ;;  %s3904_s1 = inlined_call_operand.vmem [shape: bf16[2,16,128], index: 1, kind: input, shape index: {}]   ;;  %s3905_s2 = inlined_call_operand.vmem [shape: f32[2,1,128], index: 2, kind: input, shape index: {}]   ;;  %s3906_s3 = inlined_call_operand.vmem [shape: f32[2,32,1], index: 3, kind: input, shape index: {}]   ;;  %s3907_s4 = inlined_call_operand.vmem [shape: bf16[32,16], index: 4, kind: input, shape index: {}]   ;;  %s3908_s5 = inlined_call_operand.vmem [shape: f32[32,1], index: 5, kind: input, shape index: {}]   ;;  %s3909_s6 = inlined_call_operand.vmem [shape: bf16[128,16], index: 6, kind: input, shape index: {}]   ;;  %s3910_s7 = inlined_call_operand.vmem [shape: f32[128,1], index: 7, kind: input, shape index: {}]   ;;  %s3911_s8 = inlined_call_operand.vmem [shape: f32[128,1], index: 8, kind: input, shape index: {}]   ;;  %s3912_s9 = inlined_call_operand.vmem [shape: f32[128,1], index: 9, kind: input, shape index: {}]   ;;  %s3913_s10 = inlined_call_operand.vmem [shape: bf16[32,128], index: 10, kind: input, shape index: {}]   ;;  %s3914_s11 = inlined_call_operand.vmem [shape: bf16[32,128], index: 11, kind: input, shape index: {}]   ;;  %s3915_s12 = inlined_call_operand.vmem [shape: bf16[32,32], index: 12, kind: input, shape index: {}]   ;;  %s3916_s13 = inlined_call_operand.vmem [shape: bf16[128,32], index: 13, kind: input, shape index: {}]   ;;  %s3917_s14 = inlined_call_operand.vmem [shape: f32[128,1], index: 14, kind: input, shape index: {}]   ;;  %s3918_s15 = inlined_call_operand.vmem [shape: bf16[2,128,128], index: 15, kind: output, shape index: {}]  }
   0x1   :  { %s3061_s20 = smov 0  }
   0x2 LB: > { %3921 = sst [smem:[#allocation2_spill]] %s2970_s19  ;;  %s34_s21 = sadd.s32 1, %s2970_s19  ;;  %s2974_s20 = sphi %s3061_s20, %s25_s20   ;;  %s2970_s19 = sphi %s3059_s19, %s3941_s19   ;;  %s2966_s18 = sphi %s3057_s18, %s3940_s18  }
   0x3   : > { %p2620_p0 = scmp.ge.s32.totalorder %s2974_s20, 1  ;;  %p35_p1 = scmp.ge.s32.totalorder %s34_s21, 2 }
   0x4   : > { %p494_p2 = scmp.lt.s32.totalorder %s2974_s20, 3 }
   0x5   : > { %s3943_s21 = smov (%p35_p1, %s34_s21), 0 }
   0x6   : > { %3922 = sst [smem:[#allocation3_spill]] %s3943_s21  ;;  %p495_p3 = pnand %p2620_p0, %p494_p2 }
   0x8   : > { %498 = sbr.rel (%p495_p3) target bundleno = 926 (0x39e), region = 80 }
   0xd   : > { %v957_v0 = vld [vmem:[%s3911_s8 + $0x60] sm:$0xff]  ;;  %v1074_v1 = vld [vmem:[%s3912_s9 + $0x70] sm:$0xff]  ;;  %p567_p4 = scmp.lt.s32.totalorder %s2966_s18, 1  ;;  %v2976_v3 = vmov 0   ;;  %v958_v5 = vld [vmem:[%s3911_s8 + $0x68] sm:$0xff]  ;;  %vm652_vm0 = vcmask 130048  }
   0xe   : > { %v959_v2 = vld [vmem:[%s3911_s8 + $0x70] sm:$0xff]  ;;  %2870 = vset.pattern.permute.xlu2 %v2976_v3  ;;  %2869 = vset.pattern.permute.xlu1 %v2976_v3  ;;  %v1075_v6 = vld [vmem:[%s3912_s9 + $0x78] sm:$0xff]  ;;  %v2764_v8 = vld [vmem:[%s3909_s6 + $0x8] sm:$0xff]  ;;  %vm2170_vm1 = vcmask 261120  }
   0xf   : > { %2868 = vset.pattern.permute.xlu0 %v2976_v3  ;;  %1023 = vperm.xlu2 %2870, %v957_v0   ;;  %s3945_s18 = smov (!%p567_p4, %s2966_s18), 1  ;;  %v960_v7 = vld [vmem:[%s3911_s8 + $0x78] sm:$0xff]  ;;  %v2761_v10 = vld [vmem:[%s3907_s4] sm:$0xff]  ;;  %v955_v11 = vld [vmem:[%s3911_s8 + $0x50] sm:$0xff] }
  0x10   : > { %1148 = vperm.xlu1 %2869, %v1074_v1   ;;  %1033 = vperm.xlu0 %2868, %v959_v2   ;;  %s2755_s28 = sshll.u32 %s3945_s18, 3  ;;  %s588_s16 = scalar_lea.vmem %s3905_s2, %s3945_s18  ;;  %v1073_v12 = vld [vmem:[%s3912_s9 + $0x68] sm:$0xff]  ;;  %v1072_v13 = vld [vmem:[%s3912_s9 + $0x60] sm:$0xff]  ;;  %v1071_v14 = vld [vmem:[%s3912_s9 + $0x58] sm:$0xff] }
  0x11   : > { %s582_s23 = scalar_lea.vmem %s3904_s1, %s2755_s28  ;;  %v1070_v15 = vld [vmem:[%s3912_s9 + $0x50] sm:$0xff]  ;;  %v956_v16 = vld [vmem:[%s3911_s8 + $0x58] sm:$0xff]  ;;  %v2762_v18 = vld [vmem:[%s3907_s4 + $0x8] sm:$0xff]  ;;  %s2757_s25 = sshll.u32 %s3945_s18, 5 }
  0x12   : > { %v2760_v4 = vld [vmem:[%s582_s23] sm:$0xff]  ;;  %s574_s23 = scalar_lea.vmem %s3903_s0, %s2755_s28  ;;  %v2765_v17 = vld [vmem:[%s3909_s6 + $0x10] sm:$0xff]  ;;  %v954_v20 = vld [vmem:[%s3911_s8 + $0x48] sm:$0xff]  ;;  %s3308_s26 = scalar_lea.vmem %s3906_s3, %s2757_s25 }
  0x13   : > { %2832 = vmatpush.bf16.msra.mxu1 %v2760_v4  ;;  %v2759_v9 = vld [vmem:[%s574_s23] sm:$0xff]  ;;  %v745_v22 = vld [vmem:[%s3910_s7 + $0x78] sm:$0xff]  ;;  %v744_v23 = vld [vmem:[%s3910_s7 + $0x70] sm:$0xff]  ;;  %s2758_s19 = sshll.u32 %s3945_s18, 6 }
  0x14   : > { %666 = vmatpush.bf16.msra.mxu0 %v2759_v9  ;;  %v1068_v19 = vld [vmem:[%s3912_s9 + $0x40] sm:$0xff]  ;;  %v1069_v24 = vld [vmem:[%s3912_s9 + $0x48] sm:$0xff]  ;;  %v2766_v25 = vld [vmem:[%s3909_s6 + $0x18] sm:$0xff]  ;;  %s3884_s27 = scalar_lea.vmem %s3918_s15, %s2758_s19 }
  0x15   : > { %v953_v21 = vld [vmem:[%s3911_s8 + $0x40] sm:$0xff]  ;;  %v1066_v27 = vld [vmem:[%s3912_s9 + $0x30] sm:$0xff]  ;;  %v952_v28 = vld [vmem:[%s3911_s8 + $0x38] sm:$0xff] }
  0x16   : > { %2680 = vmatmul.msk.bf16.vlgmr.msra.gmra.mxu1 %vm652_vm0, %v2764_v8  ;;  %v2763_v26 = vld [vmem:[%s3909_s6] sm:$0xff]  ;;  %v951_v29 = vld [vmem:[%s3911_s8 + $0x30] sm:$0xff]  ;;  %v743_v30 = vld [vmem:[%s3910_s7 + $0x68] sm:$0xff] }
  0x17   : > { %1028 = vperm.xlu2 %2870, %v958_v5   ;;  %2641 = vmatmul.msk.bf16.vlgmr.msra.gmra.mxu0 %vm652_vm0, %v2761_v10  ;;  %v742_v31 = vld [vmem:[%s3910_s7 + $0x60] sm:$0xff]  ;;  %v1067_v32 = vld [vmem:[%s3912_s9 + $0x38] sm:$0xff]  ;;  %v950_v35 = vld [vmem:[%s3911_s8 + $0x28] sm:$0xff] }
  0x18   : > { %1153 = vperm.xlu1 %2869, %v1075_v6   ;;  %1038 = vperm.xlu0 %2868, %v960_v7   ;;  %v2767_v33 = vld [vmem:[%s3909_s6 + $0x20] sm:$0xff]  ;;  %v741_v37 = vld [vmem:[%s3910_s7 + $0x58] sm:$0xff]  ;;  %v740_v38 = vld [vmem:[%s3910_s7 + $0x50] sm:$0xff] }
  0x19   : > { %903 = vmatpush.bf16.msrb.mxu0 %v2760_v4  ;;  %v1064_v34 = vld [vmem:[%s3912_s9 + $0x20] sm:$0xff]  ;;  %v1065_v39 = vld [vmem:[%s3912_s9 + $0x28] sm:$0xff]  ;;  %v1062_v41 = vld [vmem:[%s3912_s9 + $0x10] sm:$0xff] }
  0x1a   : > { %v949_v36 = vld [vmem:[%s3911_s8 + $0x20] sm:$0xff]  ;;  %v2768_v40 = vld [vmem:[%s3909_s6 + $0x28] sm:$0xff]  ;;  %v948_v42 = vld [vmem:[%s3911_s8 + $0x18] sm:$0xff] }
  0x1b   : > { %v947_v43 = vld [vmem:[%s3911_s8 + $0x10] sm:$0xff]  ;;  %v739_v44 = vld [vmem:[%s3910_s7 + $0x48] sm:$0xff]  ;;  %v738_v45 = vld [vmem:[%s3910_s7 + $0x40] sm:$0xff] }
  0x1c   : > { %v1063_v46 = vld [vmem:[%s3912_s9 + $0x18] sm:$0xff]  ;;  %v2769_v47 = vld [vmem:[%s3909_s6 + $0x30] sm:$0xff]  ;;  %v1060_v49 = vld [vmem:[%s3912_s9] sm:$0xff] }
  0x1d   : > { %v946_v50 = vld [vmem:[%s3911_s8 + $0x8] sm:$0xff]  ;;  %v945_v51 = vld [vmem:[%s3911_s8] sm:$0xff]  ;;  %v737_v53 = vld [vmem:[%s3910_s7 + $0x38] sm:$0xff] }
  0x1e   : > { %v736_v54 = vld [vmem:[%s3910_s7 + $0x30] sm:$0xff]  ;;  %v1061_v55 = vld [vmem:[%s3912_s9 + $0x8] sm:$0xff]  ;;  %v2770_v56 = vld [vmem:[%s3909_s6 + $0x38] sm:$0xff] }
  0x1f   : > { %1013 = vperm.xlu2 %2870, %v955_v11   ;;  %v732_v58 = vld [vmem:[%s3910_s7 + $0x10] sm:$0xff]  ;;  %v735_v59 = vld [vmem:[%s3910_s7 + $0x28] sm:$0xff]  ;;  %v734_v60 = vld [vmem:[%s3910_s7 + $0x20] sm:$0xff] }
  0x20   : > { %1143 = vperm.xlu1 %2869, %v1073_v12   ;;  %1138 = vperm.xlu0 %2868, %v1072_v13   ;;  %v3268_v61 = vld [vmem:[%s588_s16] ss:$0 sm:$0xff]  ;;  %v731_v2 = vld [vmem:[%s3910_s7 + $0x8] sm:$0xff]  ;;  %v733_v5 = vld [vmem:[%s3910_s7 + $0x18] sm:$0xff] }
  0x21   : > { %v730_v4 = vld [vmem:[%s3910_s7] sm:$0xff] }
  0x22   : > { %v612_v13 = vld [vmem:[%s3908_s5] sm:$0xff] }
  0x26   : > { %2681 = vmatmul.msk.bf16.gmra.mxu1 %vm652_vm0, %v2765_v17  ;;  %v614_v17 = vld [vmem:[%s3908_s5 + $0x10] sm:$0xff] }
  0x27   : > { %1133 = vperm.xlu2 %2870, %v1071_v14   ;;  %2642 = vmatmul.msk.bf16.gmra.mxu0 %vm652_vm0, %v2762_v18 }
  0x28   : > { %1128 = vperm.xlu1 %2869, %v1070_v15   ;;  %1018 = vperm.xlu0 %2868, %v956_v16   ;;  %v615_v16 = vld [vmem:[%s3908_s5 + $0x18] sm:$0xff] }
  0x2f   : > { %1118 = vperm.xlu2 %2870, %v1068_v19  }
  0x30   : > { %1008 = vperm.xlu1 %2869, %v954_v20   ;;  %1003 = vperm.xlu0 %2868, %v953_v21  }
  0x36   : > { %2682 = vmatmul.msk.bf16.gmra.mxu1 %vm652_vm0, %v2766_v25 }
  0x37   : > { %823 = vperm.xlu2 %2870, %v745_v22   ;;  %2679 = vmatmul.msk.bf16.vlgmr.msrb.gmra.mxu0 %vm652_vm0, %v2763_v26 }
  0x38   : > { %818 = vperm.xlu1 %2869, %v744_v23   ;;  %1123 = vperm.xlu0 %2868, %v1069_v24  }
  0x3f   : > { %1108 = vperm.xlu2 %2870, %v1066_v27  }
  0x40   : > { %998 = vperm.xlu1 %2869, %v952_v28   ;;  %993 = vperm.xlu0 %2868, %v951_v29  }
  0x46   : > { %2683 = vmatmul.msk.bf16.gmra.mxu1 %vm652_vm0, %v2767_v33 }
  0x47   : > { %813 = vperm.xlu2 %2870, %v743_v30   ;;  %v2139_v30 = vld [vmem:[%s3308_s26 + $0x18] sm:$0xff] }
  0x48   : > { %808 = vperm.xlu1 %2869, %v742_v31   ;;  %1113 = vperm.xlu0 %2868, %v1067_v32  }
  0x4f   : > { %1098 = vperm.xlu2 %2870, %v1064_v34  }
  0x50   : > { %988 = vperm.xlu1 %2869, %v950_v35   ;;  %983 = vperm.xlu0 %2868, %v949_v36   ;;  %v613_v35 = vld [vmem:[%s3908_s5 + $0x8] sm:$0xff]  ;;  %v2138_v36 = vld [vmem:[%s3308_s26 + $0x10] sm:$0xff] }
  0x56   : > { %2684 = vmatmul.msk.bf16.gmra.mxu1 %vm652_vm0, %v2768_v40 }
  0x57   : > { %803 = vperm.xlu2 %2870, %v741_v37  }
  0x58   : > { %798 = vperm.xlu1 %2869, %v740_v38   ;;  %1103 = vperm.xlu0 %2868, %v1065_v39  }
  0x5f   : > { %1088 = vperm.xlu2 %2870, %v1062_v41  }
  0x60   : > { %978 = vperm.xlu1 %2869, %v948_v42   ;;  %973 = vperm.xlu0 %2868, %v947_v43  }
  0x66   : > { %2685 = vmatmul.msk.bf16.gmra.mxu1 %vm652_vm0, %v2769_v47 }
  0x67   : > { %793 = vperm.xlu2 %2870, %v739_v44  }
  0x68   : > { %788 = vperm.xlu1 %2869, %v738_v45   ;;  %1093 = vperm.xlu0 %2868, %v1063_v46  }
  0x69   : > { %v1024_v48 = vpop.permute.xlu2 %1023 }
  0x6a   : > { %v1056_v18 = vmul.f32 %v3268_v61, %v1024_v48 }
  0x6f   : > { %1078 = vperm.xlu2 %2870, %v1060_v49  }
  0x70   : > { %968 = vperm.xlu1 %2869, %v946_v50   ;;  %963 = vperm.xlu0 %2868, %v945_v51  }
  0x71   : > { %v1029_v52 = vpop.permute.xlu2 %1028 }
  0x72   : > { %v1057_v19 = vmul.f32 %v3268_v61, %v1029_v52 }
  0x76   : > { %2686 = vmatmul.msk.bf16.gmra.mxu1 %vm652_vm0, %v2770_v56 }
  0x77   : > { %783 = vperm.xlu2 %2870, %v737_v53  }
  0x78   : > { %778 = vperm.xlu1 %2869, %v736_v54   ;;  %1083 = vperm.xlu0 %2868, %v1061_v55   ;;  %v2250_v55 = vld [vmem:[%s3917_s14] sm:$0xff] }
  0x79   : > { %v1014_v57 = vpop.permute.xlu2 %1013 }
  0x7a   : > { %v1054_v39 = vmul.f32 %v3268_v61, %v1014_v57 }
  0x7f   : > { %758 = vperm.xlu2 %2870, %v732_v58  }
  0x80   : > { %773 = vperm.xlu1 %2869, %v735_v59   ;;  %768 = vperm.xlu0 %2868, %v734_v60  }
  0x81   : > { %v3270_v62 = vpop.permute.xlu2 %1133 }
  0x82   : > { %v1149_v63 = vpop.permute.xlu1 %1148  ;;  %v1034_v0 = vpop.permute.xlu0 %1033 }
  0x83   : > { %v1058_v1 = vmul.f32 %v3268_v61, %v1034_v0  ;;  %v2137_v0 = vld [vmem:[%s3308_s26 + $0x8] sm:$0xff] }
  0x85   : > { %v1170_v3 = vadd.f32 %v1149_v63, %v1058_v1  ;;  %v2136_v1 = vld [vmem:[%s3308_s26] sm:$0xff] }
  0x87   : > { %v1626_v6 = vpack.c.bf16 %v1170_v3, %v1170_v3  ;;  %753 = vperm.xlu2 %2870, %v731_v2  }
  0x88   : > { %748 = vperm.xlu1 %2869, %v730_v4   ;;  %763 = vperm.xlu0 %2868, %v733_v5  }
  0x89   : > { %v3282_v7 = vunpack.c.l.bf16 %v1626_v6  ;;  %v3284_v8 = vpop.permute.xlu2 %1118 }
  0x8a   : > { %v1154_v9 = vpop.permute.xlu1 %1153  ;;  %v1039_v10 = vpop.permute.xlu0 %1038 }
  0x8b   : > { %v1690_v11 = vmul.f32 0.044677734, %v3282_v7  ;;  %v1059_v12 = vmul.f32 %v3268_v61, %v1039_v10 }
  0x8d   : > { %v1706_v14 = vpack.c.bf16 %v1690_v11, %v1690_v11  ;;  %v1171_v15 = vadd.f32 %v1154_v9, %v1059_v12 }
  0x8f   : > { %v1722_v20 = vunpack.c.l.bf16 %v1706_v14  ;;  %v1627_v21 = vpack.c.bf16 %v1171_v15, %v1171_v15  ;;  %618 = vperm.xlu2 %2870, %v612_v13  }
  0x90   : > { %633 = vperm.xlu1 %2869, %v615_v16   ;;  %628 = vperm.xlu0 %2868, %v614_v17  }
  0x91   : > { %v1738_v22 = vmul.f32 %v1722_v20, %v3282_v7  ;;  %v3301_v23 = vunpack.c.l.bf16 %v1627_v21  ;;  %v3303_v24 = vpop.permute.xlu2 %823 }
  0x92   : > { %v1144_v25 = vpop.permute.xlu1 %1143  ;;  %v1139_v26 = vpop.permute.xlu0 %1138 }
  0x93   : > { %v1691_v27 = vmul.f32 0.044677734, %v3301_v23  ;;  %v1169_v28 = vadd.f32 %v1144_v25, %v1057_v19  ;;  %v1168_v29 = vadd.f32 %v1139_v26, %v1056_v18  ;;  %v1754_v31 = vpack.c.bf16 %v1738_v22, %v1738_v22  ;;  %v3316_v37 = vpop.f32.mrf.mxu1 }
  0x95   : > { %v1707_v32 = vpack.c.bf16 %v1691_v27, %v1691_v27  ;;  %v1625_v33 = vpack.c.bf16 %v1169_v28, %v1169_v28  ;;  %v1624_v34 = vpack.c.bf16 %v1168_v29, %v1168_v29  ;;  %v1770_v38 = vunpack.c.l.bf16 %v1754_v31  ;;  %v2253_v28 = vld [vmem:[%s3917_s14 + $0x18] sm:$0xff] }
  0x97   : > { %v1723_v40 = vunpack.c.l.bf16 %v1707_v32  ;;  %v3319_v41 = vunpack.c.l.bf16 %v1625_v33  ;;  %v3321_v42 = vunpack.c.l.bf16 %v1624_v34  ;;  %2157 = vperm.xlu2 %2870, %v2139_v30   ;;  %v1786_v43 = vmul.f32 %v1770_v38, %v3282_v7 }
  0x98   : > { %623 = vperm.xlu0 %2868, %v613_v35   ;;  %2152 = vperm.xlu1 %2869, %v2138_v36   ;;  %v2252_v35 = vld [vmem:[%s3917_s14 + $0x10] sm:$0xff]  ;;  %v2251_v36 = vld [vmem:[%s3917_s14 + $0x8] sm:$0xff] }
  0x99   : > { %v1739_v44 = vmul.f32 %v1723_v40, %v3301_v23  ;;  %v1689_v45 = vmul.f32 0.044677734, %v3319_v41  ;;  %v1688_v46 = vmul.f32 0.044677734, %v3321_v42  ;;  %v3327_v47 = vpop.permute.xlu2 %1108  ;;  %v1802_v50 = vpack.c.bf16 %v1786_v43, %v1786_v43 }
  0x9a   : > { %v1129_v48 = vpop.permute.xlu1 %1128  ;;  %v1019_v49 = vpop.permute.xlu0 %1018 }
  0x9b   : > { %v1705_v51 = vpack.c.bf16 %v1689_v45, %v1689_v45  ;;  %v1704_v52 = vpack.c.bf16 %v1688_v46, %v1688_v46  ;;  %v1166_v53 = vadd.f32 %v1129_v48, %v1054_v39  ;;  %v1055_v54 = vmul.f32 %v3268_v61, %v1019_v49  ;;  %v3336_v2 = vpop.f32.mrf.mxu1 }
  0x9c   : > { %v1755_v56 = vpack.c.bf16 %v1739_v44, %v1739_v44  ;;  %v1818_v57 = vunpack.c.l.bf16 %v1802_v50 }
  0x9d   : > { %v1721_v58 = vunpack.c.l.bf16 %v1705_v51  ;;  %v1720_v59 = vunpack.c.l.bf16 %v1704_v52  ;;  %v1622_v60 = vpack.c.bf16 %v1166_v53, %v1166_v53  ;;  %v1167_v63 = vadd.f32 %v3270_v62, %v1055_v54 }
  0x9e   : > { %v1771_v3 = vunpack.c.l.bf16 %v1755_v56  ;;  %v1834_v4 = vadd.f32 %v1818_v57, %v3282_v7 }
  0x9f   : > { %v1737_v5 = vmul.f32 %v1721_v58, %v3319_v41  ;;  %v1736_v6 = vmul.f32 %v1720_v59, %v3321_v42  ;;  %v3341_v9 = vunpack.c.l.bf16 %v1622_v60  ;;  %v1623_v10 = vpack.c.bf16 %v1167_v63, %v1167_v63  ;;  %2268 = vperm.xlu2 %2870, %v2250_v55  }
  0xa0   : > { %2147 = vperm.xlu1 %2869, %v2137_v0   ;;  %2142 = vperm.xlu0 %2868, %v2136_v1   ;;  %v1787_v11 = vmul.f32 %v1771_v3, %v3301_v23  ;;  %v1850_v62 = vpack.c.bf16 %v1834_v4, %v1834_v4 }
  0xa1   : > { %v1753_v12 = vpack.c.bf16 %v1737_v5, %v1737_v5  ;;  %v1752_v13 = vpack.c.bf16 %v1736_v6, %v1736_v6  ;;  %v1686_v14 = vmul.f32 0.044677734, %v3341_v9  ;;  %v3345_v15 = vunpack.c.l.bf16 %v1623_v10  ;;  %v3347_v16 = vpop.permute.xlu2 %813  ;;  %v2256_v5 = vld [vmem:[%s3917_s14 + $0x30] sm:$0xff] }
  0xa2   : > { %v1009_v17 = vpop.permute.xlu1 %1008  ;;  %v1004_v18 = vpop.permute.xlu0 %1003  ;;  %v1803_v19 = vpack.c.bf16 %v1787_v11, %v1787_v11  ;;  %v1866_v20 = vunpack.c.l.bf16 %v1850_v62 }
  0xa3   : > { %v1769_v21 = vunpack.c.l.bf16 %v1753_v12  ;;  %v1768_v22 = vunpack.c.l.bf16 %v1752_v13  ;;  %v1702_v25 = vpack.c.bf16 %v1686_v14, %v1686_v14  ;;  %v1687_v26 = vmul.f32 0.044677734, %v3345_v15  ;;  %v3363_v39 = vpop.f32.mrf.mxu1  ;;  %v2255_v13 = vld [vmem:[%s3917_s14 + $0x28] sm:$0xff]  ;;  %v2254_v14 = vld [vmem:[%s3917_s14 + $0x20] sm:$0xff] }
  0xa4   : > { %v1052_v27 = vmul.f32 %v3268_v61, %v1004_v18  ;;  %v1819_v29 = vunpack.c.l.bf16 %v1803_v19  ;;  %v1882_v30 = vmul.f32 0.796875, %v1866_v20  ;;  %v1053_v49 = vmul.f32 %v3268_v61, %v1009_v17 }
  0xa5   : > { %v1785_v31 = vmul.f32 %v1769_v21, %v3319_v41  ;;  %v1784_v32 = vmul.f32 %v1768_v22, %v3321_v42  ;;  %v1718_v33 = vunpack.c.l.bf16 %v1702_v25  ;;  %v1703_v34 = vpack.c.bf16 %v1687_v26, %v1687_v26 }
  0xa6   : > { %v1164_v38 = vadd.f32 %v3284_v8, %v1052_v27  ;;  %v1835_v40 = vadd.f32 %v1819_v29, %v3301_v23  ;;  %v1898_v43 = vpack.c.bf16 %v1882_v30, %v1882_v30  ;;  %v1658_v20 = vmul.f32 0.5, %v3282_v7 }
  0xa7   : > { %v1801_v44 = vpack.c.bf16 %v1785_v31, %v1785_v31  ;;  %v1800_v45 = vpack.c.bf16 %v1784_v32, %v1784_v32  ;;  %v1734_v46 = vmul.f32 %v1718_v33, %v3341_v9  ;;  %v1719_v48 = vunpack.c.l.bf16 %v1703_v34  ;;  %2283 = vperm.xlu2 %2870, %v2253_v28  }
  0xa8   : > { %v1620_v50 = vpack.c.bf16 %v1164_v38, %v1164_v38  ;;  %2278 = vperm.xlu1 %2869, %v2252_v35   ;;  %2273 = vperm.xlu0 %2868, %v2251_v36   ;;  %v1851_v51 = vpack.c.bf16 %v1835_v40, %v1835_v40  ;;  %v1914_v52 = vunpack.c.l.bf16 %v1898_v43 }
  0xa9   : > { %v1750_v53 = vpack.c.bf16 %v1734_v46, %v1734_v46  ;;  %v1735_v8 = vmul.f32 %v1719_v48, %v3345_v15  ;;  %v3369_v54 = vpop.permute.xlu2 %1098  ;;  %v1816_v55 = vunpack.c.l.bf16 %v1800_v45  ;;  %v1817_v56 = vunpack.c.l.bf16 %v1801_v44 }
  0xaa   : > { %v3371_v57 = vunpack.c.l.bf16 %v1620_v50  ;;  %v3373_v58 = vpop.permute.xlu1 %818  ;;  %v1124_v59 = vpop.permute.xlu0 %1123  ;;  %v1867_v60 = vunpack.c.l.bf16 %v1851_v51  ;;  %2872 = vtanh.f32 %v1914_v52  ;;  %v1659_v48 = vmul.f32 0.5, %v3301_v23  ;;  %v2259_v52 = vld [vmem:[%s3917_s14 + $0x48] sm:$0xff]  ;;  %v2257_v23 = vld [vmem:[%s3917_s14 + $0x38] sm:$0xff] }
  0xab   : > { %v1766_v63 = vunpack.c.l.bf16 %v1750_v53  ;;  %v1751_v0 = vpack.c.bf16 %v1735_v8, %v1735_v8  ;;  %v1165_v1 = vadd.f32 %v1124_v59, %v1053_v49  ;;  %v1832_v3 = vadd.f32 %v1816_v55, %v3321_v42  ;;  %v3388_v19 = vpop.f32.mrf.mxu1 }
  0xac   : > { %v1684_v4 = vmul.f32 0.044677734, %v3371_v57  ;;  %v1883_v6 = vmul.f32 0.796875, %v1867_v60  ;;  %v1833_v10 = vadd.f32 %v1817_v56, %v3319_v41  ;;  %v1674_v49 = vpack.c.bf16 %v1658_v20, %v1658_v20  ;;  %v2258_v60 = vld [vmem:[%s3917_s14 + $0x40] sm:$0xff] }
  0xad   : > { %v1782_v11 = vmul.f32 %v1766_v63, %v3341_v9  ;;  %v1767_v62 = vunpack.c.l.bf16 %v1751_v0  ;;  %v1621_v12 = vpack.c.bf16 %v1165_v1, %v1165_v1  ;;  %v1848_v17 = vpack.c.bf16 %v1832_v3, %v1832_v3  ;;  %v3409_v63 = vpop.f32.mrf.mxu0 }
  0xae   : > { %v1700_v18 = vpack.c.bf16 %v1684_v4, %v1684_v4  ;;  %v1899_v21 = vpack.c.bf16 %v1883_v6, %v1883_v6  ;;  %v1849_v22 = vpack.c.bf16 %v1833_v10, %v1833_v10  ;;  %3923 = vst [vmem:[#allocation4_spill] sm:$0xff] %v3409_v63 }
  0xaf   : > { %v1798_v25 = vpack.c.bf16 %v1782_v11, %v1782_v11  ;;  %v3391_v26 = vunpack.c.l.bf16 %v1621_v12  ;;  %2298 = vperm.xlu2 %2870, %v2256_v5   ;;  %v1864_v27 = vunpack.c.l.bf16 %v1848_v17  ;;  %v1783_v28 = vmul.f32 %v1767_v62, %v3345_v15 }
  0xb0   : > { %v2873_v29 = vpop.eup %2872  ;;  %v1716_v30 = vunpack.c.l.bf16 %v1700_v18  ;;  %2293 = vperm.xlu1 %2869, %v2255_v13   ;;  %2288 = vperm.xlu0 %2868, %v2254_v14   ;;  %v1915_v31 = vunpack.c.l.bf16 %v1899_v21  ;;  %v1865_v32 = vunpack.c.l.bf16 %v1849_v22  ;;  %v1675_v11 = vpack.c.bf16 %v1659_v48, %v1659_v48  ;;  %v2261_v48 = vld [vmem:[%s3917_s14 + $0x58] sm:$0xff] }
  0xb1   : > { %v1685_v33 = vmul.f32 0.044677734, %v3391_v26  ;;  %v3395_v34 = vpop.permute.xlu2 %803  ;;  %v1946_v7 = vpack.c.bf16 %v2873_v29, %v2873_v29  ;;  %v1880_v35 = vmul.f32 0.796875, %v1864_v27  ;;  %v1799_v36 = vpack.c.bf16 %v1783_v28, %v1783_v28 }
  0xb2   : > { %v1732_v38 = vmul.f32 %v1716_v30, %v3371_v57  ;;  %v999_v40 = vpop.permute.xlu1 %998  ;;  %v994_v43 = vpop.permute.xlu0 %993  ;;  %2874 = vtanh.f32 %v1915_v31  ;;  %v1881_v44 = vmul.f32 0.796875, %v1865_v32  ;;  %v1814_v45 = vunpack.c.l.bf16 %v1798_v25 }
  0xb3   : > { %v1701_v46 = vpack.c.bf16 %v1685_v33, %v1685_v33  ;;  %v1962_v50 = vunpack.c.l.bf16 %v1946_v7  ;;  %v1896_v53 = vpack.c.bf16 %v1880_v35, %v1880_v35  ;;  %v1815_v55 = vunpack.c.l.bf16 %v1799_v36  ;;  %v3412_v1 = vpop.f32.mrf.mxu1  ;;  %v2262_v36 = vld [vmem:[%s3917_s14 + $0x60] sm:$0xff] }
  0xb4   : > { %v1748_v51 = vpack.c.bf16 %v1732_v38, %v1732_v38  ;;  %v1897_v8 = vpack.c.bf16 %v1881_v44, %v1881_v44  ;;  %v1050_v59 = vmul.f32 %v3268_v61, %v994_v43  ;;  %v1830_v0 = vadd.f32 %v1814_v45, %v3341_v9 }
  0xb5   : > { %v1717_v56 = vunpack.c.l.bf16 %v1701_v46  ;;  %v1978_v3 = vadd.f32 1.0, %v1962_v50  ;;  %v1912_v4 = vunpack.c.l.bf16 %v1896_v53  ;;  %v1831_v6 = vadd.f32 %v1815_v55, %v3345_v15 }
  0xb6   : > { %v1913_v5 = vunpack.c.l.bf16 %v1897_v8  ;;  %v1846_v62 = vpack.c.bf16 %v1830_v0, %v1830_v0  ;;  %v1764_v13 = vunpack.c.l.bf16 %v1748_v51  ;;  %v2010_v14 = vunpack.c.l.bf16 %v1674_v49  ;;  %v2260_v49 = vld [vmem:[%s3917_s14 + $0x50] sm:$0xff] }
  0xb7   : > { %v1733_v10 = vmul.f32 %v1717_v56, %v3391_v26  ;;  %2313 = vperm.xlu2 %2870, %v2259_v52   ;;  %2876 = vtanh.f32 %v1912_v4  ;;  %v1847_v17 = vpack.c.bf16 %v1831_v6, %v1831_v6  ;;  %v1051_v20 = vmul.f32 %v3268_v61, %v999_v40 }
  0xb8   : > { %v2875_v12 = vpop.eup %2874  ;;  %2308 = vperm.xlu1 %2869, %v2258_v60   ;;  %2303 = vperm.xlu0 %2868, %v2257_v23   ;;  %v1162_v21 = vadd.f32 %v3327_v47, %v1050_v59  ;;  %v1994_v29 = vpack.c.bf16 %v1978_v3, %v1978_v3  ;;  %2878 = vtanh.f32 %v1913_v5  ;;  %v1862_v30 = vunpack.c.l.bf16 %v1846_v62  ;;  %v3438_v60 = vpop.f32.mrf.mxu0 }
  0xb9   : > { %v1749_v18 = vpack.c.bf16 %v1733_v10, %v1733_v10  ;;  %v3418_v22 = vpop.permute.xlu2 %1088  ;;  %v1947_v25 = vpack.c.bf16 %v2875_v12, %v2875_v12  ;;  %v1863_v31 = vunpack.c.l.bf16 %v1847_v17  ;;  %v2011_v35 = vunpack.c.l.bf16 %v1675_v11  ;;  %3924 = vst [vmem:[#allocation5_spill] sm:$0xff] %v3438_v60 }
  0xba   : > { %v3420_v27 = vpop.permute.xlu1 %808  ;;  %v1114_v28 = vpop.permute.xlu0 %1113  ;;  %v1656_v47 = vmul.f32 0.5, %v3321_v42  ;;  %v1878_v38 = vmul.f32 0.796875, %v1862_v30  ;;  %v1780_v43 = vmul.f32 %v1764_v13, %v3371_v57  ;;  %v1618_v45 = vpack.c.bf16 %v1162_v21, %v1162_v21 }
  0xbb   : > { %v1765_v32 = vunpack.c.l.bf16 %v1749_v18  ;;  %v1163_v33 = vadd.f32 %v1114_v28, %v1051_v20  ;;  %v1963_v7 = vunpack.c.l.bf16 %v1947_v25  ;;  %v1879_v40 = vmul.f32 0.796875, %v1863_v31  ;;  %v3434_v52 = vpop.f32.mrf.mxu1 }
  0xbc   : > { %v2026_v42 = vunpack.c.l.bf16 %v1994_v29  ;;  %v1894_v53 = vpack.c.bf16 %v1878_v38, %v1878_v38  ;;  %v1796_v55 = vpack.c.bf16 %v1780_v43, %v1780_v43  ;;  %v1657_v0 = vmul.f32 0.5, %v3319_v41 }
  0xbd   : > { %v1781_v44 = vmul.f32 %v1765_v32, %v3391_v26  ;;  %v1619_v46 = vpack.c.bf16 %v1163_v33, %v1163_v33  ;;  %v1979_v50 = vadd.f32 1.0, %v1963_v7  ;;  %v2877_v51 = vpop.eup %2876  ;;  %v1895_v8 = vpack.c.bf16 %v1879_v40, %v1879_v40  ;;  %v2265_v33 = vld [vmem:[%s3917_s14 + $0x78] sm:$0xff] }
  0xbe   : > { %v2879_v3 = vpop.eup %2878  ;;  %v1944_v4 = vpack.c.bf16 %v2877_v51, %v2877_v51  ;;  %v1910_v5 = vunpack.c.l.bf16 %v1894_v53  ;;  %v1812_v10 = vunpack.c.l.bf16 %v1796_v55  ;;  %v3441_v11 = vunpack.c.l.bf16 %v1618_v45 }
  0xbf   : > { %v1797_v56 = vpack.c.bf16 %v1781_v44, %v1781_v44  ;;  %v3436_v59 = vunpack.c.l.bf16 %v1619_v46  ;;  %2328 = vperm.xlu2 %2870, %v2262_v36   ;;  %v1995_v23 = vpack.c.bf16 %v1979_v50, %v1979_v50  ;;  %v1911_v6 = vunpack.c.l.bf16 %v1895_v8 }
  0xc0   : > { %2323 = vperm.xlu1 %2869, %v2261_v48   ;;  %2318 = vperm.xlu0 %2868, %v2260_v49   ;;  %v1672_v13 = vpack.c.bf16 %v1656_v47, %v1656_v47  ;;  %v1945_v17 = vpack.c.bf16 %v2879_v3, %v2879_v3  ;;  %v2042_v21 = vmul.f32 %v2026_v42, %v2010_v14  ;;  %v1960_v25 = vunpack.c.l.bf16 %v1944_v4  ;;  %v2264_v47 = vld [vmem:[%s3917_s14 + $0x70] sm:$0xff] }
  0xc1   : > { %v3443_v62 = vpop.permute.xlu2 %793  ;;  %v2027_v12 = vunpack.c.l.bf16 %v1995_v23  ;;  %v1654_v41 = vmul.f32 0.5, %v3341_v9  ;;  %2880 = vtanh.f32 %v1910_v5  ;;  %v1683_v28 = vmul.f32 0.044677734, %v3436_v59 }
  0xc2   : > { %v989_v18 = vpop.permute.xlu1 %988  ;;  %v984_v20 = vpop.permute.xlu0 %983  ;;  %v1813_v30 = vunpack.c.l.bf16 %v1797_v56  ;;  %v1828_v31 = vadd.f32 %v1812_v10, %v3371_v57  ;;  %v1961_v7 = vunpack.c.l.bf16 %v1945_v17  ;;  %v1976_v36 = vadd.f32 1.0, %v1960_v25 }
  0xc3   : > { %v1048_v29 = vmul.f32 %v3268_v61, %v984_v20  ;;  %v2043_v32 = vmul.f32 %v2027_v12, %v2011_v35  ;;  %2882 = vtanh.f32 %v1911_v6  ;;  %v1682_v14 = vmul.f32 0.044677734, %v3441_v11  ;;  %v3457_v43 = vpop.f32.mrf.mxu1  ;;  %v2263_v35 = vld [vmem:[%s3917_s14 + $0x68] sm:$0xff] }
  0xc4   : > { %v1673_v38 = vpack.c.bf16 %v1657_v0, %v1657_v0  ;;  %v1977_v44 = vadd.f32 1.0, %v1961_v7  ;;  %v1992_v45 = vpack.c.bf16 %v1976_v36, %v1976_v36  ;;  %v1655_v46 = vmul.f32 0.5, %v3345_v15  ;;  %v3467_v15 = vpop.f32.mrf.mxu0 }
  0xc5   : > { %v1160_v9 = vadd.f32 %v3369_v54, %v1048_v29  ;;  %v2051_v40 = vpack.c.bf16 %v2043_v32, %v2042_v21  ;;  %v1699_v48 = vpack.c.bf16 %v1683_v28, %v1683_v28  ;;  %v2008_v49 = vunpack.c.l.bf16 %v1672_v13  ;;  %3925 = vst [vmem:[#allocation6_spill] sm:$0xff] %v3467_v15 }
  0xc6   : > { %v1829_v54 = vadd.f32 %v1813_v30, %v3391_v26  ;;  %v1993_v51 = vpack.c.bf16 %v1977_v44, %v1977_v44  ;;  %v2024_v42 = vunpack.c.l.bf16 %v1992_v45  ;;  %v1670_v53 = vpack.c.bf16 %v1654_v41, %v1654_v41 }
  0xc7   : > { %2343 = vperm.xlu2 %2870, %v2265_v33   ;;  %v2881_v50 = vpop.eup %2880  ;;  %2107 = vmatpush.bf16.msra.mxu3 %v2051_v40  ;;  %v1844_v8 = vpack.c.bf16 %v1828_v31, %v1828_v31  ;;  %v1698_v55 = vpack.c.bf16 %v1682_v14, %v1682_v14  ;;  %v1049_v56 = vmul.f32 %v3268_v61, %v989_v18  ;;  %v2009_v10 = vunpack.c.l.bf16 %v1673_v38 }
  0xc8   : > { %2338 = vperm.xlu1 %2869, %v2264_v47   ;;  %v1616_v23 = vpack.c.bf16 %v1160_v9, %v1160_v9  ;;  %2333 = vperm.xlu0 %2868, %v2263_v35   ;;  %v1942_v3 = vpack.c.bf16 %v2881_v50, %v2881_v50  ;;  %v2025_v12 = vunpack.c.l.bf16 %v1993_v51  ;;  %v2040_v13 = vmul.f32 %v2024_v42, %v2008_v49 }
  0xc9   : > { %v3465_v0 = vpop.permute.xlu2 %1078  ;;  %v2883_v4 = vpop.eup %2882  ;;  %v1671_v17 = vpack.c.bf16 %v1655_v46, %v1655_v46  ;;  %v1715_v20 = vunpack.c.l.bf16 %v1699_v48  ;;  %v1845_v41 = vpack.c.bf16 %v1829_v54, %v1829_v54  ;;  %v2006_v29 = vunpack.c.l.bf16 %v1670_v53 }
  0xca   : > { %v3469_v5 = vpop.permute.xlu1 %798  ;;  %v1104_v6 = vpop.permute.xlu0 %1103  ;;  %v1943_v25 = vpack.c.bf16 %v2883_v4, %v2883_v4  ;;  %v2041_v18 = vmul.f32 %v2025_v12, %v2009_v10  ;;  %v1958_v28 = vunpack.c.l.bf16 %v1942_v3  ;;  %v1860_v30 = vunpack.c.l.bf16 %v1844_v8 }
  0xcb   : > { %v1161_v21 = vadd.f32 %v1104_v6, %v1049_v56  ;;  %v1714_v31 = vunpack.c.l.bf16 %v1698_v55  ;;  %v3471_v32 = vunpack.c.l.bf16 %v1616_v23  ;;  %v927_v14 = vpop.f32.mrf.mxu1  ;;  %v3474_v47 = vmul.f32 0.5, %v3371_v57 }
  0xcc   : > { %v1959_v7 = vunpack.c.l.bf16 %v1943_v25  ;;  %v2050_v36 = vpack.c.bf16 %v2041_v18, %v2040_v13  ;;  %v1974_v9 = vadd.f32 1.0, %v1958_v28  ;;  %v3477_v38 = vmul.f32 0.5, %v3391_v26  ;;  %v3493_v6 = vpop.f32.mrf.mxu0 }
  0xcd   : > { %v1617_v33 = vpack.c.bf16 %v1161_v21, %v1161_v21  ;;  %v1731_v40 = vmul.f32 %v1715_v20, %v3436_v59  ;;  %v928_v44 = vadd.f32 %v927_v14, %v3443_v62  ;;  %v1861_v45 = vunpack.c.l.bf16 %v1845_v41  ;;  %3926 = vst [vmem:[#allocation7_spill] sm:$0xff] %v3493_v6 }
  0xce   : > { %2108 = vmatpush.bf16.msra.mxu3 %v2050_v36  ;;  %v1975_v46 = vadd.f32 1.0, %v1959_v7  ;;  %v1990_v48 = vpack.c.bf16 %v1974_v9, %v1974_v9  ;;  %v2007_v49 = vunpack.c.l.bf16 %v1671_v17  ;;  %v1876_v54 = vmul.f32 0.796875, %v1860_v30 }
  0xcf   : > { %v3480_v35 = vunpack.c.l.bf16 %v1617_v33  ;;  %v3484_v50 = vmul.f32 %v1714_v31, %v3441_v11  ;;  %v1680_v57 = vmul.f32 0.044677734, %v3471_v32  ;;  %v1181_v51 = vpack.c.bf16 %v928_v44, %v928_v44 }
  0xd0   : > { %v1991_v62 = vpack.c.bf16 %v1975_v46, %v1975_v46  ;;  %v2022_v56 = vunpack.c.l.bf16 %v1990_v48  ;;  %v1668_v23 = vpack.c.bf16 %v3474_v47, %v3474_v47  ;;  %v1747_v3 = vpack.c.bf16 %v1731_v40, %v1731_v40 }
  0xd1   : > { %v1681_v26 = vmul.f32 0.044677734, %v3480_v35  ;;  %v784_v42 = vpop.permute.xlu2 %783  ;;  %v3491_v4 = vunpack.c.l.bf16 %v1181_v51  ;;  %v1669_v10 = vpack.c.bf16 %v3477_v38, %v3477_v38  ;;  %v1877_v12 = vmul.f32 0.796875, %v1861_v45 }
  0xd2   : > { %v923_v53 = vadd.f32 %v3434_v52, %v784_v42  ;;  %v979_v8 = vpop.permute.xlu1 %978  ;;  %v974_v55 = vpop.permute.xlu0 %973  ;;  %v2023_v52 = vunpack.c.l.bf16 %v1991_v62  ;;  %v1892_v20 = vpack.c.bf16 %v1876_v54, %v1876_v54  ;;  %v1746_v21 = vpack.c.bf16 %v3484_v50, %v3484_v50 }
  0xd3   : > { %v1046_v17 = vmul.f32 %v3268_v61, %v974_v55  ;;  %v1696_v25 = vpack.c.bf16 %v1680_v57, %v1680_v57  ;;  %v1697_v41 = vpack.c.bf16 %v1681_v26, %v1681_v26  ;;  %v1245_v18 = vmul.f32 0.044677734, %v3491_v4  ;;  %v930_v7 = vpop.f32.mrf.mxu1 }
  0xd4   : > { %v1179_v13 = vpack.c.bf16 %v923_v53, %v923_v53  ;;  %v2038_v31 = vmul.f32 %v2022_v56, %v2006_v29  ;;  %v2039_v33 = vmul.f32 %v2023_v52, %v2007_v49  ;;  %v1763_v36 = vunpack.c.l.bf16 %v1747_v3 }
  0xd5   : > { %v1158_v30 = vadd.f32 %v3418_v22, %v1046_v17  ;;  %v1261_v14 = vpack.c.bf16 %v1245_v18, %v1245_v18  ;;  %v931_v9 = vadd.f32 %v930_v7, %v3469_v5  ;;  %v1893_v40 = vpack.c.bf16 %v1877_v12, %v1877_v12 }
  0xd6   : > { %v3501_v28 = vunpack.c.l.bf16 %v1179_v13  ;;  %v2049_v46 = vpack.c.bf16 %v2039_v33, %v2038_v31  ;;  %v1908_v48 = vunpack.c.l.bf16 %v1892_v20  ;;  %v1712_v54 = vunpack.c.l.bf16 %v1696_v25 }
  0xd7   : > { %v1614_v45 = vpack.c.bf16 %v1158_v30, %v1158_v30  ;;  %v1277_v50 = vunpack.c.l.bf16 %v1261_v14  ;;  %v1047_v57 = vmul.f32 %v3268_v61, %v979_v8  ;;  %v1182_v26 = vpack.c.bf16 %v931_v9, %v931_v9 }
  0xd8   : > { %v1243_v44 = vmul.f32 0.044677734, %v3501_v28  ;;  %v1713_v22 = vunpack.c.l.bf16 %v1697_v41  ;;  %2109 = vmatpush.bf16.msra.mxu3 %v2049_v46  ;;  %v1909_v3 = vunpack.c.l.bf16 %v1893_v40  ;;  %v3516_v41 = vpop.f32.mrf.mxu0  ;;  %2884 = vtanh.f32 %v1908_v48 }
  0xd9   : > { %v759_v51 = vpop.permute.xlu2 %758  ;;  %v3507_v49 = vunpack.c.l.bf16 %v1614_v45  ;;  %v1293_v55 = vmul.f32 %v1277_v50, %v3491_v4  ;;  %v3511_v62 = vunpack.c.l.bf16 %v1182_v26  ;;  %v1728_v9 = vmul.f32 %v1712_v54, %v3471_v32 }
  0xda   : > { %v1259_v29 = vpack.c.bf16 %v1243_v44, %v1243_v44  ;;  %v911_v42 = vadd.f32 %v3316_v37, %v759_v51  ;;  %v789_v5 = vpop.permute.xlu1 %788  ;;  %v1094_v53 = vpop.permute.xlu0 %1093  ;;  %v1729_v37 = vmul.f32 %v1713_v22, %v3480_v35  ;;  %2886 = vtanh.f32 %v1909_v3 }
  0xdb   : > { %v926_v56 = vadd.f32 %v3457_v43, %v789_v5  ;;  %v1678_v8 = vmul.f32 0.044677734, %v3507_v49  ;;  %v1159_v17 = vadd.f32 %v1094_v53, %v1047_v57  ;;  %v1309_v52 = vpack.c.bf16 %v1293_v55, %v1293_v55  ;;  %v932_v31 = vpop.f32.mrf.mxu1 }
  0xdc   : > { %v1275_v12 = vunpack.c.l.bf16 %v1259_v29  ;;  %v1174_v13 = vpack.c.bf16 %v911_v42, %v911_v42  ;;  %v1246_v20 = vmul.f32 0.044677734, %v3511_v62  ;;  %v933_v50 = vadd.f32 %v932_v31, %v3395_v34 }
  0xdd   : > { %v1180_v25 = vpack.c.bf16 %v926_v56, %v926_v56  ;;  %v1615_v43 = vpack.c.bf16 %v1159_v17, %v1159_v17  ;;  %v1694_v33 = vpack.c.bf16 %v1678_v8, %v1678_v8  ;;  %v1325_v40 = vunpack.c.l.bf16 %v1309_v52 }
  0xde   : > { %v1291_v18 = vmul.f32 %v1275_v12, %v3501_v28  ;;  %v3520_v30 = vunpack.c.l.bf16 %v1174_v13  ;;  %v1262_v7 = vpack.c.bf16 %v1246_v20, %v1246_v20  ;;  %v3533_v57 = vunpack.c.l.bf16 %v1668_v23  ;;  %v2885_v29 = vpop.eup %2884 }
  0xdf   : > { %v3522_v14 = vunpack.c.l.bf16 %v1180_v25  ;;  %v3527_v48 = vunpack.c.l.bf16 %v1615_v43  ;;  %v1762_v26 = vunpack.c.l.bf16 %v1746_v21  ;;  %v3536_v51 = vmul.f32 %v1763_v36, %v3436_v59 }
  0xe0   : > { %v1307_v44 = vpack.c.bf16 %v1291_v18, %v1291_v18  ;;  %v1238_v45 = vmul.f32 0.044677734, %v3520_v30  ;;  %v1745_v54 = vpack.c.bf16 %v1729_v37, %v1729_v37  ;;  %v3539_v22 = vmul.f32 0.5, %v3441_v11  ;;  %v2887_v36 = vpop.eup %2886 }
  0xe1   : > { %v1244_v46 = vmul.f32 0.044677734, %v3522_v14  ;;  %v1710_v42 = vunpack.c.l.bf16 %v1694_v33  ;;  %v1278_v5 = vunpack.c.l.bf16 %v1262_v7  ;;  %v1183_v55 = vpack.c.bf16 %v933_v50, %v933_v50  ;;  %v754_v31 = vpop.permute.xlu2 %753  ;;  %v907_v33 = vpop.f32.mrf.mxu0 }
  0xe2   : > { %v1254_v53 = vpack.c.bf16 %v1238_v45, %v1238_v45  ;;  %v1744_v56 = vpack.c.bf16 %v1728_v9, %v1728_v9  ;;  %v1341_v34 = vmul.f32 %v1325_v40, %v3491_v4  ;;  %v1323_v3 = vunpack.c.l.bf16 %v1307_v44  ;;  %v969_v47 = vpop.permute.xlu1 %968  ;;  %v964_v23 = vpop.permute.xlu0 %963 }
  0xe3   : > { %v3545_v21 = vunpack.c.l.bf16 %v1669_v10  ;;  %v1260_v12 = vpack.c.bf16 %v1244_v46, %v1244_v46  ;;  %v1679_v8 = vmul.f32 0.044677734, %v3527_v48  ;;  %v3548_v13 = vunpack.c.l.bf16 %v1183_v55  ;;  %v935_v52 = vpop.f32.mrf.mxu1 }
  0xe4   : > { %v3551_v17 = vmul.f32 0.5, %v3436_v59  ;;  %v1761_v20 = vunpack.c.l.bf16 %v1745_v54  ;;  %v1940_v25 = vpack.c.bf16 %v2885_v29, %v2885_v29  ;;  %v1726_v38 = vmul.f32 %v1710_v42, %v3507_v49 }
  0xe5   : > { %v1294_v10 = vmul.f32 %v1278_v5, %v3511_v62  ;;  %v1270_v18 = vunpack.c.l.bf16 %v1254_v53  ;;  %v1247_v43 = vmul.f32 0.044677734, %v3548_v13  ;;  %v3560_v7 = vunpack.c.l.bf16 %v1744_v56 }
  0xe6   : > { %v1357_v9 = vpack.c.bf16 %v1341_v34, %v1341_v34  ;;  %v1339_v40 = vmul.f32 %v1323_v3, %v3501_v28  ;;  %v1941_v44 = vpack.c.bf16 %v2887_v36, %v2887_v36  ;;  %v1276_v45 = vunpack.c.l.bf16 %v1260_v12 }
  0xe7   : > { %v1695_v46 = vpack.c.bf16 %v1679_v8, %v1679_v8  ;;  %v1263_v50 = vpack.c.bf16 %v1247_v43, %v1247_v43  ;;  %v1044_v54 = vmul.f32 %v3268_v61, %v964_v23  ;;  %v3565_v29 = vmul.f32 %v1761_v20, %v3480_v35 }
  0xe8   : > { %v908_v42 = vadd.f32 %v907_v33, %v754_v31  ;;  %v1956_v5 = vunpack.c.l.bf16 %v1940_v25  ;;  %v3568_v53 = vmul.f32 %v1762_v26, %v3441_v11  ;;  %v1742_v55 = vpack.c.bf16 %v1726_v38, %v1726_v38 }
  0xe9   : > { %v1310_v56 = vpack.c.bf16 %v1294_v10, %v1294_v10  ;;  %v1286_v34 = vmul.f32 %v1270_v18, %v3520_v30  ;;  %v1279_v37 = vunpack.c.l.bf16 %v1263_v50  ;;  %v1373_v3 = vunpack.c.l.bf16 %v1357_v9 }
  0xea   : > { %v1355_v36 = vpack.c.bf16 %v1339_v40, %v1339_v40  ;;  %v1173_v12 = vpack.c.bf16 %v908_v42, %v908_v42  ;;  %v1957_v8 = vunpack.c.l.bf16 %v1941_v44  ;;  %v1292_v43 = vmul.f32 %v1276_v45, %v3522_v14  ;;  %v779_v18 = vpop.permute.xlu1 %778  ;;  %v1084_v31 = vpop.permute.xlu0 %1083 }
  0xeb   : > { %v1711_v23 = vunpack.c.l.bf16 %v1695_v46  ;;  %v1156_v20 = vadd.f32 %v3465_v0, %v1044_v54  ;;  %v1972_v10 = vadd.f32 1.0, %v1956_v5  ;;  %v3581_v9 = vunpack.c.l.bf16 %v1742_v55 }
  0xec   : > { %v3577_v38 = vunpack.c.l.bf16 %v1173_v12  ;;  %v1326_v40 = vunpack.c.l.bf16 %v1310_v56  ;;  %v1302_v44 = vpack.c.bf16 %v1286_v34, %v1286_v34  ;;  %v1295_v0 = vmul.f32 %v1279_v37, %v3548_v13 }
  0xed   : > { %v3585_v45 = vadd.f32 %v1373_v3, %v3491_v4  ;;  %v1371_v46 = vunpack.c.l.bf16 %v1355_v36  ;;  %v1973_v54 = vadd.f32 1.0, %v1957_v8  ;;  %v1308_v42 = vpack.c.bf16 %v1292_v43, %v1292_v43 }
  0xee   : > { %3927 = vst [vmem:[#allocation8_spill] sm:$0xff] %v3577_v38  ;;  %v1237_v50 = vmul.f32 0.044677734, %v3577_v38  ;;  %v1727_v5 = vmul.f32 %v1711_v23, %v3527_v48  ;;  %v1612_v12 = vpack.c.bf16 %v1156_v20, %v1156_v20  ;;  %v1988_v26 = vpack.c.bf16 %v1972_v10, %v1972_v10 }
  0xef   : > { %v1045_v25 = vmul.f32 %v3268_v61, %v969_v47  ;;  %v1989_v33 = vpack.c.bf16 %v1973_v54, %v1973_v54  ;;  %v936_v56 = vadd.f32 %v935_v52, %v3420_v27  ;;  %v1342_v37 = vmul.f32 %v1326_v40, %v3511_v62 }
  0xf0   : > { %v1253_v55 = vpack.c.bf16 %v1237_v50, %v1237_v50  ;;  %v1318_v34 = vunpack.c.l.bf16 %v1302_v44  ;;  %v1311_v3 = vpack.c.bf16 %v1295_v0, %v1295_v0  ;;  %v2020_v63 = vunpack.c.l.bf16 %v1988_v26  ;;  %v937_v0 = vpop.f32.mrf.mxu1 }
  0xf1   : > { %v2021_v6 = vunpack.c.l.bf16 %v1989_v33  ;;  %v1184_v60 = vpack.c.bf16 %v936_v56, %v936_v56  ;;  %v921_v8 = vadd.f32 %v3412_v1, %v779_v18  ;;  %v1324_v43 = vunpack.c.l.bf16 %v1308_v42 }
  0xf2   : > { %v1269_v36 = vunpack.c.l.bf16 %v1253_v55  ;;  %v1743_v23 = vpack.c.bf16 %v1727_v5, %v1727_v5  ;;  %v3593_v20 = vunpack.c.l.bf16 %v1612_v12  ;;  %v1157_v10 = vadd.f32 %v1084_v31, %v1045_v25 }
  0xf3   : > { %v2036_v61 = vmul.f32 %v2020_v63, %v3533_v57  ;;  %v2037_v47 = vmul.f32 %v2021_v6, %v3545_v21  ;;  %v3597_v27 = vunpack.c.l.bf16 %v1184_v60  ;;  %v1178_v52 = vpack.c.bf16 %v921_v8, %v921_v8  ;;  %v774_v63 = vpop.permute.xlu1 %773  ;;  %v769_v57 = vpop.permute.xlu0 %768 }
  0xf4   : > { %v3600_v40 = vadd.f32 %v1371_v46, %v3501_v28  ;;  %v1358_v26 = vpack.c.bf16 %v1342_v37, %v1342_v37  ;;  %v1327_v33 = vunpack.c.l.bf16 %v1311_v3  ;;  %v1613_v44 = vpack.c.bf16 %v1157_v10, %v1157_v10 }
  0xf5   : > { %v1285_v1 = vmul.f32 %v1269_v36, %v3577_v38  ;;  %v2048_v18 = vpack.c.bf16 %v2037_v47, %v2036_v61  ;;  %v1248_v50 = vmul.f32 0.044677734, %v3597_v27  ;;  %v3604_v25 = vunpack.c.l.bf16 %v1178_v52 }
  0xf6   : > { %v1334_v60 = vmul.f32 %v1318_v34, %v3520_v30  ;;  %v1340_v6 = vmul.f32 %v1324_v43, %v3522_v14  ;;  %v1759_v21 = vunpack.c.l.bf16 %v1743_v23  ;;  %v3608_v31 = vunpack.c.l.bf16 %v1613_v44 }
  0xf7   : > { %v1676_v46 = vmul.f32 0.044677734, %v3593_v20  ;;  %2110 = vmatpush.bf16.msra.mxu3 %v2048_v18  ;;  %v1264_v54 = vpack.c.bf16 %v1248_v50, %v1248_v50  ;;  %v1242_v42 = vmul.f32 0.044677734, %v3604_v25  ;;  %v938_v5 = vadd.f32 %v937_v0, %v3347_v16 }
  0xf8   : > { %v1343_v12 = vmul.f32 %v1327_v33, %v3548_v13  ;;  %v1677_v55 = vmul.f32 0.044677734, %v3608_v31  ;;  %v918_v56 = vadd.f32 %v3388_v19, %v774_v63  ;;  %v916_v37 = vadd.f32 %v3363_v39, %v769_v57 }
  0xf9   : > { %v1301_v34 = vpack.c.bf16 %v1285_v1, %v1285_v1  ;;  %v1280_v3 = vunpack.c.l.bf16 %v1264_v54  ;;  %v1258_v36 = vpack.c.bf16 %v1242_v42, %v1242_v42  ;;  %v1185_v8 = vpack.c.bf16 %v938_v5, %v938_v5 }
  0xfa   : > { %v1693_v43 = vpack.c.bf16 %v1677_v55, %v1677_v55  ;;  %v1177_v23 = vpack.c.bf16 %v918_v56, %v918_v56  ;;  %v1176_v10 = vpack.c.bf16 %v916_v37, %v916_v37  ;;  %v3928_v61 = vpack.c.bf16 %v3568_v53, %v3568_v53 }
  0xfb   : > { %v1692_v16 = vpack.c.bf16 %v1676_v46, %v1676_v46  ;;  %v1296_v52 = vmul.f32 %v1280_v3, %v3597_v27  ;;  %v1274_v33 = vunpack.c.l.bf16 %v1258_v36  ;;  %v3621_v44 = vunpack.c.l.bf16 %v1185_v8 }
  0xfc   : > { %v1810_v47 = vunpack.c.l.bf16 %v3928_v61  ;;  %v1709_v19 = vunpack.c.l.bf16 %v1693_v43  ;;  %v3623_v0 = vunpack.c.l.bf16 %v1177_v23  ;;  %v3625_v39 = vunpack.c.l.bf16 %v1176_v10  ;;  %v940_v61 = vpop.f32.mrf.mxu1 }
  0xfd   : > { %v3929_v1 = vpack.c.bf16 %v3536_v51, %v3536_v51  ;;  %v1317_v50 = vunpack.c.l.bf16 %v1301_v34  ;;  %v1312_v63 = vpack.c.bf16 %v1296_v52, %v1296_v52  ;;  %v1290_v53 = vmul.f32 %v1274_v33, %v3604_v25 }
  0xfe   : > { %v1249_v57 = vmul.f32 0.044677734, %v3621_v44  ;;  %v1374_v46 = vunpack.c.l.bf16 %v1358_v26  ;;  %v1241_v54 = vmul.f32 0.044677734, %v3623_v0  ;;  %v1240_v42 = vmul.f32 0.044677734, %v3625_v39 }
  0xff   : > { %v1811_v18 = vunpack.c.l.bf16 %v3929_v1  ;;  %v1826_v5 = vadd.f32 %v1810_v47, %v3441_v11  ;;  %v1350_v55 = vpack.c.bf16 %v1334_v60, %v1334_v60  ;;  %v1356_v56 = vpack.c.bf16 %v1340_v6, %v1340_v6 }
 0x100   : > { %v3636_v37 = vmul.f32 %v1759_v21, %v3527_v48  ;;  %v1725_v51 = vmul.f32 %v1709_v19, %v3608_v31  ;;  %v1359_v34 = vpack.c.bf16 %v1343_v12, %v1343_v12  ;;  %v1328_v3 = vunpack.c.l.bf16 %v1312_v63 }
 0x101   : > { %v1306_v36 = vpack.c.bf16 %v1290_v53, %v1290_v53  ;;  %v1827_v8 = vadd.f32 %v1811_v18, %v3436_v59  ;;  %v1708_v43 = vunpack.c.l.bf16 %v1692_v16  ;;  %v1333_v26 = vmul.f32 %v1317_v50, %v3577_v38 }
 0x102   : > { %v1265_v23 = vpack.c.bf16 %v1249_v57, %v1249_v57  ;;  %v1842_v10 = vpack.c.bf16 %v1826_v5, %v1826_v5  ;;  %v3642_v11 = vadd.f32 %v1374_v46, %v3511_v62  ;;  %v1257_v60 = vpack.c.bf16 %v1241_v54, %v1241_v54 }
 0x103   : > { %v1256_v6 = vpack.c.bf16 %v1240_v42, %v1240_v42  ;;  %v1843_v21 = vpack.c.bf16 %v1827_v8, %v1827_v8  ;;  %v1366_v47 = vunpack.c.l.bf16 %v1350_v55  ;;  %v1372_v52 = vunpack.c.l.bf16 %v1356_v56 }
 0x104   : > { %v1741_v33 = vpack.c.bf16 %v1725_v51, %v1725_v51  ;;  %v1858_v12 = vunpack.c.l.bf16 %v1842_v10  ;;  %v1375_v19 = vunpack.c.l.bf16 %v1359_v34  ;;  %v1344_v1 = vmul.f32 %v1328_v3, %v3597_v27 }
 0x105   : > { %v1322_v59 = vunpack.c.l.bf16 %v1306_v36  ;;  %v1859_v16 = vunpack.c.l.bf16 %v1843_v21  ;;  %v1724_v18 = vmul.f32 %v1708_v43, %v3593_v20  ;;  %v1349_v50 = vpack.c.bf16 %v1333_v26, %v1333_v26 }
 0x106   : > { %v1281_v63 = vunpack.c.l.bf16 %v1265_v23  ;;  %v1874_v53 = vmul.f32 0.796875, %v1858_v12  ;;  %v1273_v46 = vunpack.c.l.bf16 %v1257_v60  ;;  %v1272_v54 = vunpack.c.l.bf16 %v1256_v6 }
 0x107   : > { %v1875_v42 = vmul.f32 0.796875, %v1859_v16  ;;  %v3649_v5 = vadd.f32 %v1366_v47, %v3520_v30  ;;  %v3652_v55 = vadd.f32 %v1372_v52, %v3522_v14  ;;  %v1757_v56 = vunpack.c.l.bf16 %v1741_v33  ;;  %v749_v52 = vpop.permute.xlu1 %748  ;;  %v764_v33 = vpop.permute.xlu0 %763 }
 0x108   : > { %v1890_v51 = vpack.c.bf16 %v1874_v53, %v1874_v53  ;;  %v3655_v34 = vadd.f32 %v1375_v19, %v3548_v13  ;;  %v1360_v3 = vpack.c.bf16 %v1344_v1, %v1344_v1  ;;  %v1338_v36 = vmul.f32 %v1322_v59, %v3604_v25  ;;  %v942_v59 = vpop.f32.mrf.mxu1 }
 0x109   : > { %v1891_v8 = vpack.c.bf16 %v1875_v42, %v1875_v42  ;;  %v1740_v43 = vpack.c.bf16 %v1724_v18, %v1724_v18  ;;  %v1365_v26 = vunpack.c.l.bf16 %v1349_v50  ;;  %v1297_v23 = vmul.f32 %v1281_v63, %v3621_v44 }
 0x10a   : > { %v1906_v10 = vunpack.c.l.bf16 %v1890_v51  ;;  %v1289_v60 = vmul.f32 %v1273_v46, %v3623_v0  ;;  %v1288_v6 = vmul.f32 %v1272_v54, %v3625_v39  ;;  %v941_v47 = vadd.f32 %v940_v61, %v3373_v58 }
 0x10b   : > { %v1907_v21 = vunpack.c.l.bf16 %v1891_v8  ;;  %v3663_v12 = vmul.f32 %v1757_v56, %v3608_v31  ;;  %v906_v19 = vadd.f32 %v3516_v41, %v749_v52  ;;  %v913_v1 = vadd.f32 %v3336_v2, %v764_v33 }
 0x10c   : > { %2888 = vtanh.f32 %v1906_v10  ;;  %v1376_v16 = vunpack.c.l.bf16 %v1360_v3  ;;  %v1354_v18 = vpack.c.bf16 %v1338_v36, %v1338_v36  ;;  %v1186_v50 = vpack.c.bf16 %v941_v47, %v941_v47 }
 0x10d   : > { %2890 = vtanh.f32 %v1907_v21  ;;  %v1313_v63 = vpack.c.bf16 %v1297_v23, %v1297_v23  ;;  %v1172_v53 = vpack.c.bf16 %v906_v19, %v906_v19  ;;  %v1175_v46 = vpack.c.bf16 %v913_v1, %v913_v1 }
 0x10e   : > { %v943_v58 = vadd.f32 %v942_v59, %v3303_v24  ;;  %v3668_v61 = vunpack.c.l.bf16 %v1740_v43  ;;  %v1305_v54 = vpack.c.bf16 %v1289_v60, %v1289_v60  ;;  %v1304_v42 = vpack.c.bf16 %v1288_v6, %v1288_v6 }
 0x10f   : > { %v3670_v56 = vunpack.c.l.bf16 %v1186_v50  ;;  %v3673_v41 = vadd.f32 %v1365_v26, %v3577_v38  ;;  %v3675_v2 = vunpack.c.l.bf16 %v1172_v53  ;;  %v3677_v51 = vunpack.c.l.bf16 %v1175_v46 }
 0x110   : > { %v1187_v3 = vpack.c.bf16 %v943_v58, %v943_v58  ;;  %v3680_v36 = vadd.f32 %v1376_v16, %v3597_v27  ;;  %v3682_v8 = vunpack.c.l.bf16 %v1354_v18  ;;  %v1329_v10 = vunpack.c.l.bf16 %v1313_v63 }
 0x111   : > { %v1250_v43 = vmul.f32 0.044677734, %v3670_v56  ;;  %v1236_v26 = vmul.f32 0.044677734, %v3675_v2  ;;  %v1239_v60 = vmul.f32 0.044677734, %v3677_v51  ;;  %v1321_v47 = vunpack.c.l.bf16 %v1305_v54 }
 0x112   : > { %v2889_v23 = vpop.eup %2888  ;;  %v3689_v6 = vunpack.c.l.bf16 %v1187_v3  ;;  %v1320_v52 = vunpack.c.l.bf16 %v1304_v42  ;;  %v3930_v63 = vpack.c.bf16 %v3539_v22, %v3539_v22  ;;  %v1776_v58 = vmul.f32 %v3560_v7, %v3471_v32 }
 0x113   : > { %v2891_v21 = vpop.eup %2890  ;;  %v1938_v33 = vpack.c.bf16 %v2889_v23, %v2889_v23  ;;  %v1266_v19 = vpack.c.bf16 %v1250_v43, %v1250_v43  ;;  %v1252_v59 = vpack.c.bf16 %v1236_v26, %v1236_v26  ;;  %v1255_v16 = vpack.c.bf16 %v1239_v60, %v1239_v60 }
 0x114   : > { %v1939_v1 = vpack.c.bf16 %v2891_v21, %v2891_v21  ;;  %v1251_v18 = vmul.f32 0.044677734, %v3689_v6  ;;  %v2002_v53 = vunpack.c.l.bf16 %v3930_v63  ;;  %v1345_v3 = vmul.f32 %v1329_v10, %v3621_v44 }
 0x115   : > { %v1954_v50 = vunpack.c.l.bf16 %v1938_v33  ;;  %v1282_v46 = vunpack.c.l.bf16 %v1266_v19  ;;  %v1268_v42 = vunpack.c.l.bf16 %v1252_v59  ;;  %v1337_v43 = vmul.f32 %v1321_v47, %v3623_v0 }
 0x116   : > { %v1955_v54 = vunpack.c.l.bf16 %v1939_v1  ;;  %v1267_v23 = vpack.c.bf16 %v1251_v18, %v1251_v18  ;;  %v3931_v60 = vpack.c.bf16 %v3551_v17, %v3551_v17  ;;  %v1336_v22 = vmul.f32 %v1320_v52, %v3625_v39 }
 0x117   : > { %v1970_v26 = vadd.f32 1.0, %v1954_v50  ;;  %v1298_v33 = vmul.f32 %v1282_v46, %v3670_v56  ;;  %v1271_v63 = vunpack.c.l.bf16 %v1255_v16  ;;  %v1792_v10 = vpack.c.bf16 %v1776_v58, %v1776_v58 }
 0x118   : > { %v2003_v21 = vunpack.c.l.bf16 %v3931_v60  ;;  %v1971_v19 = vadd.f32 1.0, %v1955_v54  ;;  %v1283_v24 = vunpack.c.l.bf16 %v1267_v23  ;;  %v3932_v1 = vpack.c.bf16 %v3565_v29, %v3565_v29 }
 0x119   : > { %v1986_v7 = vpack.c.bf16 %v1970_v26, %v1970_v26  ;;  %v1314_v57 = vpack.c.bf16 %v1298_v33, %v1298_v33  ;;  %v1361_v47 = vpack.c.bf16 %v1345_v3, %v1345_v3  ;;  %v1284_v50 = vmul.f32 %v1268_v42, %v3675_v2 }
 0x11a   : > { %v1809_v59 = vunpack.c.l.bf16 %v3932_v1  ;;  %v1987_v18 = vpack.c.bf16 %v1971_v19, %v1971_v19  ;;  %v1299_v17 = vmul.f32 %v1283_v24, %v3689_v6  ;;  %v1808_v15 = vunpack.c.l.bf16 %v1792_v10 }
 0x11b   : > { %v2018_v60 = vunpack.c.l.bf16 %v1986_v7  ;;  %v1330_v46 = vunpack.c.l.bf16 %v1314_v57  ;;  %v1353_v16 = vpack.c.bf16 %v1337_v43, %v1337_v43  ;;  %v1287_v23 = vmul.f32 %v1271_v63, %v3677_v51 }
 0x11c   : > { %v1825_v52 = vadd.f32 %v1809_v59, %v3480_v35  ;;  %v2019_v54 = vunpack.c.l.bf16 %v1987_v18  ;;  %v1315_v58 = vpack.c.bf16 %v1299_v17, %v1299_v17  ;;  %v1352_v26 = vpack.c.bf16 %v1336_v22, %v1336_v22 }
 0x11d   : > { %v1346_v29 = vmul.f32 %v1330_v46, %v3670_v56  ;;  %v1824_v3 = vadd.f32 %v1808_v15, %v3471_v32  ;;  %v2034_v19 = vmul.f32 %v2018_v60, %v2002_v53  ;;  %v1300_v1 = vpack.c.bf16 %v1284_v50, %v1284_v50 }
 0x11e   : > { %v1841_v33 = vpack.c.bf16 %v1825_v52, %v1825_v52  ;;  %v2035_v42 = vmul.f32 %v2019_v54, %v2003_v21  ;;  %v1331_v24 = vunpack.c.l.bf16 %v1315_v58  ;;  %v1377_v7 = vunpack.c.l.bf16 %v1361_v47 }
 0x11f   : > { %v1362_v57 = vpack.c.bf16 %v1346_v29, %v1346_v29  ;;  %v1840_v10 = vpack.c.bf16 %v1824_v3, %v1824_v3  ;;  %v1303_v43 = vpack.c.bf16 %v1287_v23, %v1287_v23  ;;  %v1648_v63 = vmul.f32 0.5, %v3471_v32 }
 0x120   : > { %v1857_v38 = vunpack.c.l.bf16 %v1841_v33  ;;  %v2047_v59 = vpack.c.bf16 %v2035_v42, %v2034_v19  ;;  %v1347_v18 = vmul.f32 %v1331_v24, %v3689_v6  ;;  %v1649_v17 = vmul.f32 0.5, %v3480_v35 }
 0x121   : > { %v1378_v22 = vunpack.c.l.bf16 %v1362_v57  ;;  %v1856_v46 = vunpack.c.l.bf16 %v1840_v10  ;;  %v3718_v53 = vadd.f32 %v3682_v8, %v3604_v25  ;;  %v1369_v21 = vunpack.c.l.bf16 %v1353_v16 }
 0x122   : > { %v1873_v15 = vmul.f32 0.796875, %v1857_v38  ;;  %2111 = vmatpush.bf16.msra.mxu3 %v2047_v59  ;;  %v1316_v47 = vunpack.c.l.bf16 %v1300_v1  ;;  %v1363_v50 = vpack.c.bf16 %v1347_v18, %v1347_v18  ;;  %v1368_v60 = vunpack.c.l.bf16 %v1352_v26 }
 0x123   : > { %v1394_v52 = vadd.f32 %v1378_v22, %v3670_v56  ;;  %v1872_v54 = vmul.f32 0.796875, %v1856_v46  ;;  %v3722_v32 = vadd.f32 %v1377_v7, %v3621_v44  ;;  %v1319_v58 = vunpack.c.l.bf16 %v1303_v43 }
 0x124   : > { %v1889_v23 = vpack.c.bf16 %v1873_v15, %v1873_v15  ;;  %v1379_v35 = vunpack.c.l.bf16 %v1363_v50  ;;  %v1664_v29 = vpack.c.bf16 %v1648_v63, %v1648_v63  ;;  %v1665_v3 = vpack.c.bf16 %v1649_v17, %v1649_v17 }
 0x125   : > { %v1410_v38 = vpack.c.bf16 %v1394_v52, %v1394_v52  ;;  %v1888_v33 = vpack.c.bf16 %v1872_v54, %v1872_v54  ;;  %v1332_v16 = vmul.f32 %v1316_v47, %v3675_v2  ;;  %v1774_v26 = vmul.f32 %v3581_v9, %v3507_v49 }
 0x126   : > { %v1905_v8 = vunpack.c.l.bf16 %v1889_v23  ;;  %v1395_v19 = vadd.f32 %v1379_v35, %v3689_v6  ;;  %v3933_v42 = vpack.c.bf16 %v3636_v37, %v3636_v37  ;;  %v1646_v57 = vmul.f32 0.5, %v3507_v49 }
 0x127   : > { %v1426_v24 = vunpack.c.l.bf16 %v1410_v38  ;;  %v1904_v7 = vunpack.c.l.bf16 %v1888_v33  ;;  %v3733_v10 = vmul.f32 %v1319_v58, %v3677_v51  ;;  %v1790_v43 = vpack.c.bf16 %v1774_v26, %v1774_v26 }
 0x128   : > { %v1807_v1 = vunpack.c.l.bf16 %v3933_v42  ;;  %2892 = vtanh.f32 %v1905_v8  ;;  %v1411_v59 = vpack.c.bf16 %v1395_v19, %v1395_v19  ;;  %v3737_v63 = vadd.f32 %v1369_v21, %v3623_v0 }
 0x129   : > { %v3740_v9 = vadd.f32 %v1368_v60, %v3625_v39  ;;  %2894 = vtanh.f32 %v1904_v7  ;;  %v1647_v37 = vmul.f32 0.5, %v3527_v48  ;;  %v1348_v22 = vpack.c.bf16 %v1332_v16, %v1332_v16 }
 0x12a   : > { %v1823_v18 = vadd.f32 %v1807_v1, %v3527_v48  ;;  %v1427_v17 = vunpack.c.l.bf16 %v1411_v59  ;;  %v1806_v46 = vunpack.c.l.bf16 %v1790_v43  ;;  %v1442_v47 = vmul.f32 0.796875, %v1426_v24 }
 0x12b   : > { %v2000_v50 = vunpack.c.l.bf16 %v1664_v29  ;;  %v1662_v52 = vpack.c.bf16 %v1646_v57, %v1646_v57  ;;  %v1772_v54 = vmul.f32 %v3668_v61, %v3593_v20  ;;  %v1351_v21 = vpack.c.bf16 %v3733_v10, %v3733_v10 }
 0x12c   : > { %v1839_v15 = vpack.c.bf16 %v1823_v18, %v1823_v18  ;;  %v2001_v23 = vunpack.c.l.bf16 %v1665_v3  ;;  %v1822_v60 = vadd.f32 %v1806_v46, %v3507_v49  ;;  %v1443_v38 = vmul.f32 0.796875, %v1427_v17 }
 0x12d   : > { %v1663_v48 = vpack.c.bf16 %v1647_v37, %v1647_v37  ;;  %v1788_v33 = vpack.c.bf16 %v1772_v54, %v1772_v54  ;;  %v3934_v8 = vpack.c.bf16 %v3663_v12, %v3663_v12  ;;  %v3751_v29 = vunpack.c.l.bf16 %v1348_v22 }
 0x12e   : > { %v1855_v58 = vunpack.c.l.bf16 %v1839_v15  ;;  %v2893_v35 = vpop.eup %2892  ;;  %v1838_v26 = vpack.c.bf16 %v1822_v60, %v1822_v60  ;;  %v1458_v1 = vpack.c.bf16 %v1442_v47, %v1442_v47  ;;  %v3753_v24 = vunpack.c.l.bf16 %v1662_v52 }
 0x12f   : > { %v1805_v16 = vunpack.c.l.bf16 %v3934_v8  ;;  %v1937_v19 = vpack.c.bf16 %v2893_v35, %v2893_v35  ;;  %v2895_v42 = vpop.eup %2894  ;;  %v1804_v3 = vunpack.c.l.bf16 %v1788_v33  ;;  %v1459_v18 = vpack.c.bf16 %v1443_v38, %v1443_v38 }
 0x130   : > { %v1871_v61 = vmul.f32 0.796875, %v1855_v58  ;;  %v1936_v7 = vpack.c.bf16 %v2895_v42, %v2895_v42  ;;  %v1854_v59 = vunpack.c.l.bf16 %v1838_v26  ;;  %v3756_v37 = vunpack.c.l.bf16 %v1663_v48 }
 0x131   : > { %v1821_v49 = vadd.f32 %v1805_v16, %v3608_v31  ;;  %v1953_v57 = vunpack.c.l.bf16 %v1937_v19  ;;  %v1820_v12 = vadd.f32 %v1804_v3, %v3593_v20  ;;  %v1644_v47 = vmul.f32 0.5, %v3593_v20 }
 0x132   : > { %v1887_v43 = vpack.c.bf16 %v1871_v61, %v1871_v61  ;;  %v1952_v17 = vunpack.c.l.bf16 %v1936_v7  ;;  %v1870_v15 = vmul.f32 0.796875, %v1854_v59  ;;  %v1474_v58 = vunpack.c.l.bf16 %v1458_v1 }
 0x133   : > { %v1837_v22 = vpack.c.bf16 %v1821_v49, %v1821_v49  ;;  %v1969_v46 = vadd.f32 1.0, %v1953_v57  ;;  %v1836_v52 = vpack.c.bf16 %v1820_v12, %v1820_v12  ;;  %v1218_v48 = vmul.f32 0.5, %v3670_v56 }
 0x134   : > { %v1903_v54 = vunpack.c.l.bf16 %v1887_v43  ;;  %v1968_v35 = vadd.f32 1.0, %v1952_v17  ;;  %v1886_v8 = vpack.c.bf16 %v1870_v15, %v1870_v15  ;;  %v1475_v19 = vunpack.c.l.bf16 %v1459_v18 }
 0x135   : > { %v1853_v60 = vunpack.c.l.bf16 %v1837_v22  ;;  %v1985_v33 = vpack.c.bf16 %v1969_v46, %v1969_v46  ;;  %v1852_v16 = vunpack.c.l.bf16 %v1836_v52  ;;  %v3762_v3 = vmul.f32 0.5, %v3608_v31 }
 0x136   : > { %2896 = vtanh.f32 %v1903_v54  ;;  %v1984_v26 = vpack.c.bf16 %v1968_v35, %v1968_v35  ;;  %v1902_v42 = vunpack.c.l.bf16 %v1886_v8  ;;  %v1660_v57 = vpack.c.bf16 %v1644_v47, %v1644_v47 }
 0x137   : > { %v1869_v38 = vmul.f32 0.796875, %v1853_v60  ;;  %v2017_v61 = vunpack.c.l.bf16 %v1985_v33  ;;  %2898 = vtanh.f32 %v1474_v58  ;;  %v1868_v20 = vmul.f32 0.796875, %v1852_v16 }
 0x138   : > { %2900 = vtanh.f32 %v1475_v19  ;;  %v2016_v1 = vunpack.c.l.bf16 %v1984_v26  ;;  %v3765_v12 = vmul.f32 0.5, %v3597_v27  ;;  %v1408_v56 = vpack.c.bf16 %v3680_v36, %v3680_v36 }
 0x139   : > { %v1885_v49 = vpack.c.bf16 %v1869_v38, %v1869_v38  ;;  %v2033_v7 = vmul.f32 %v2017_v61, %v2001_v23  ;;  %2902 = vtanh.f32 %v1902_v42  ;;  %v1884_v59 = vpack.c.bf16 %v1868_v20, %v1868_v20 }
 0x13a   : > { %v2032_v22 = vmul.f32 %v2016_v1, %v2000_v50  ;;  %v1219_v31 = vmul.f32 0.5, %v3689_v6  ;;  %v1234_v17 = vpack.c.bf16 %v1218_v48, %v1218_v48  ;;  %v1409_v46 = vpack.c.bf16 %v3722_v32, %v3722_v32 }
 0x13b   : > { %v1901_v43 = vunpack.c.l.bf16 %v1885_v49  ;;  %v1900_v23 = vunpack.c.l.bf16 %v1884_v59  ;;  %v1424_v54 = vunpack.c.l.bf16 %v1408_v56  ;;  %v1661_v27 = vpack.c.bf16 %v3762_v3, %v3762_v3 }
 0x13c   : > { %v2897_v18 = vpop.eup %2896  ;;  %v2046_v52 = vpack.c.bf16 %v2033_v7, %v2032_v22  ;;  %v3774_v60 = vunpack.c.l.bf16 %v1660_v57  ;;  %v1425_v36 = vunpack.c.l.bf16 %v1409_v46  ;;  %v1235_v32 = vpack.c.bf16 %v1219_v31, %v1219_v31 }
 0x13d   : > { %v1935_v15 = vpack.c.bf16 %v2897_v18, %v2897_v18  ;;  %2904 = vtanh.f32 %v1901_v43  ;;  %v2899_v47 = vpop.eup %2898  ;;  %v1440_v35 = vmul.f32 0.796875, %v1424_v54  ;;  %v1570_v16 = vunpack.c.l.bf16 %v1234_v17 }
 0x13e   : > { %v2901_v58 = vpop.eup %2900  ;;  %2906 = vtanh.f32 %v1900_v23  ;;  %v1506_v6 = vpack.c.bf16 %v2899_v47, %v2899_v47  ;;  %2112 = vmatpush.bf16.msra.mxu3 %v2046_v52  ;;  %v1441_v38 = vmul.f32 0.796875, %v1425_v36  ;;  %v1406_v20 = vpack.c.bf16 %v3642_v11, %v3642_v11 }
 0x13f   : > { %v1951_v50 = vunpack.c.l.bf16 %v1935_v15  ;;  %v2903_v33 = vpop.eup %2902  ;;  %v1507_v8 = vpack.c.bf16 %v2901_v58, %v2901_v58  ;;  %v1456_v61 = vpack.c.bf16 %v1440_v35, %v1440_v35  ;;  %v1407_v49 = vpack.c.bf16 %v3655_v34, %v3655_v34 }
 0x140   : > { %v1934_v48 = vpack.c.bf16 %v2903_v33, %v2903_v33  ;;  %v1522_v26 = vunpack.c.l.bf16 %v1506_v6  ;;  %v1457_v3 = vpack.c.bf16 %v1441_v38, %v1441_v38  ;;  %v1422_v31 = vunpack.c.l.bf16 %v1406_v20 }
 0x141   : > { %v1967_v19 = vadd.f32 1.0, %v1951_v50  ;;  %v1523_v42 = vunpack.c.l.bf16 %v1507_v8  ;;  %v1472_v43 = vunpack.c.l.bf16 %v1456_v61  ;;  %v1571_v34 = vunpack.c.l.bf16 %v1235_v32 }
 0x142   : > { %v1950_v7 = vunpack.c.l.bf16 %v1934_v48  ;;  %v1538_v59 = vadd.f32 1.0, %v1522_v26  ;;  %v1473_v22 = vunpack.c.l.bf16 %v1457_v3  ;;  %v1423_v58 = vunpack.c.l.bf16 %v1407_v49 }
 0x143   : > { %v2905_v1 = vpop.eup %2904  ;;  %v1983_v57 = vpack.c.bf16 %v1967_v19, %v1967_v19  ;;  %v1539_v18 = vadd.f32 1.0, %v1523_v42  ;;  %2908 = vtanh.f32 %v1472_v43  ;;  %v1438_v33 = vmul.f32 0.796875, %v1422_v31 }
 0x144   : > { %v1933_v56 = vpack.c.bf16 %v2905_v1, %v2905_v1  ;;  %v2907_v17 = vpop.eup %2906  ;;  %v1966_v46 = vadd.f32 1.0, %v1950_v7  ;;  %v1554_v23 = vpack.c.bf16 %v1538_v59, %v1538_v59  ;;  %2910 = vtanh.f32 %v1473_v22 }
 0x145   : > { %v2015_v15 = vunpack.c.l.bf16 %v1983_v57  ;;  %v1932_v54 = vpack.c.bf16 %v2907_v17, %v2907_v17  ;;  %v1555_v11 = vpack.c.bf16 %v1539_v18, %v1539_v18  ;;  %v1439_v19 = vmul.f32 0.796875, %v1423_v58 }
 0x146   : > { %v1949_v47 = vunpack.c.l.bf16 %v1933_v56  ;;  %v1982_v52 = vpack.c.bf16 %v1966_v46, %v1966_v46  ;;  %v1586_v36 = vunpack.c.l.bf16 %v1554_v23  ;;  %v1454_v3 = vpack.c.bf16 %v1438_v33, %v1438_v33 }
 0x147   : > { %v1948_v50 = vunpack.c.l.bf16 %v1932_v54  ;;  %v1587_v35 = vunpack.c.l.bf16 %v1555_v11  ;;  %v2031_v38 = vmul.f32 %v2015_v15, %v3756_v37  ;;  %v1997_v7 = vunpack.c.l.bf16 %v1661_v27 }
 0x148   : > { %v1965_v6 = vadd.f32 1.0, %v1949_v47  ;;  %v2014_v8 = vunpack.c.l.bf16 %v1982_v52  ;;  %v1602_v48 = vmul.f32 %v1586_v36, %v1570_v16  ;;  %v1217_v32 = vmul.f32 0.5, %v3621_v44 }
 0x149   : > { %v1964_v26 = vadd.f32 1.0, %v1948_v50  ;;  %v1603_v42 = vmul.f32 %v1587_v35, %v1571_v34  ;;  %v2909_v20 = vpop.eup %2908  ;;  %v1455_v49 = vpack.c.bf16 %v1439_v19, %v1439_v19  ;;  %v1470_v16 = vunpack.c.l.bf16 %v1454_v3 }
 0x14a   : > { %v1981_v61 = vpack.c.bf16 %v1965_v6, %v1965_v6  ;;  %v2030_v1 = vmul.f32 %v2014_v8, %v3753_v24  ;;  %v2911_v57 = vpop.eup %2910  ;;  %v1504_v18 = vpack.c.bf16 %v2909_v20, %v2909_v20  ;;  %v1232_v24 = vpack.c.bf16 %v3765_v12, %v3765_v12 }
 0x14b   : > { %v1980_v59 = vpack.c.bf16 %v1964_v26, %v1964_v26  ;;  %v1611_v56 = vpack.c.bf16 %v1603_v42, %v1602_v48  ;;  %v1505_v37 = vpack.c.bf16 %v2911_v57, %v2911_v57  ;;  %v1471_v31 = vunpack.c.l.bf16 %v1455_v49 }
 0x14c   : > { %v2013_v43 = vunpack.c.l.bf16 %v1981_v61  ;;  %v2045_v22 = vpack.c.bf16 %v2031_v38, %v2030_v1  ;;  %v1520_v27 = vunpack.c.l.bf16 %v1504_v18  ;;  %v1233_v44 = vpack.c.bf16 %v1217_v32, %v1217_v32 }
 0x14d   : > { %v2012_v17 = vunpack.c.l.bf16 %v1980_v59  ;;  %2068 = vmatpush.bf16.msra.mxu0 %v1611_v56  ;;  %2833 = vmatpush.bf16.msra.mxu2 %v1611_v56  ;;  %v1521_v15 = vunpack.c.l.bf16 %v1505_v37  ;;  %2912 = vtanh.f32 %v1470_v16  ;;  %v1404_v23 = vpack.c.bf16 %v3652_v55, %v3652_v55 }
 0x14e   : > { %v2029_v46 = vmul.f32 %v2013_v43, %v1997_v7  ;;  %2113 = vmatpush.bf16.msra.mxu3 %v2045_v22  ;;  %v1367_v54 = vunpack.c.l.bf16 %v1351_v21  ;;  %v1536_v11 = vadd.f32 1.0, %v1520_v27  ;;  %2914 = vtanh.f32 %v1471_v31 }
 0x14f   : > { %v2028_v47 = vmul.f32 %v2012_v17, %v3774_v60  ;;  %v3793_v52 = vadd.f32 %v3751_v29, %v3675_v2  ;;  %v1537_v12 = vadd.f32 1.0, %v1521_v15  ;;  %v1405_v34 = vpack.c.bf16 %v3585_v45, %v3585_v45  ;;  %v2773_v60 = vld [vmem:[%s3914_s11] sm:$0xff] }
 0x150   : > { %v1420_v36 = vunpack.c.l.bf16 %v1404_v23  ;;  %v1552_v50 = vpack.c.bf16 %v1536_v11, %v1536_v11  ;;  %v1568_v55 = vunpack.c.l.bf16 %v1232_v24  ;;  %v1214_v6 = vmul.f32 0.5, %v3511_v62 }
 0x151   : > { %v2044_v58 = vpack.c.bf16 %v2029_v46, %v2028_v47  ;;  %v1553_v10 = vpack.c.bf16 %v1537_v12, %v1537_v12  ;;  %v1569_v21 = vunpack.c.l.bf16 %v1233_v44  ;;  %v1421_v35 = vunpack.c.l.bf16 %v1405_v34 }
 0x152   : > { %v1436_v33 = vmul.f32 0.796875, %v1420_v36  ;;  %v1584_v29 = vunpack.c.l.bf16 %v1552_v50  ;;  %v1215_v8 = vmul.f32 0.5, %v3548_v13  ;;  %v1402_v45 = vpack.c.bf16 %v3718_v53, %v3718_v53 }
 0x153   : > { %2114 = vmatpush.bf16.msra.mxu3 %v2044_v58  ;;  %v1403_v38 = vpack.c.bf16 %v3600_v40, %v3600_v40  ;;  %v2913_v48 = vpop.eup %2912  ;;  %v1585_v62 = vunpack.c.l.bf16 %v1553_v10  ;;  %v1212_v19 = vmul.f32 0.5, %v3522_v14  ;;  %v1437_v26 = vmul.f32 0.796875, %v1421_v35 }
 0x154   : > { %v1452_v61 = vpack.c.bf16 %v1436_v33, %v1436_v33  ;;  %v2915_v42 = vpop.eup %2914  ;;  %v1600_v3 = vmul.f32 %v1584_v29, %v1568_v55  ;;  %v1502_v20 = vpack.c.bf16 %v2913_v48, %v2913_v48  ;;  %v1418_v1 = vunpack.c.l.bf16 %v1402_v45 }
 0x155   : > { %v1419_v7 = vunpack.c.l.bf16 %v1403_v38  ;;  %v1601_v32 = vmul.f32 %v1585_v62, %v1569_v21  ;;  %v1503_v49 = vpack.c.bf16 %v2915_v42, %v2915_v42  ;;  %v1453_v13 = vpack.c.bf16 %v1437_v26, %v1437_v26  ;;  %v2774_v42 = vld [vmem:[%s3914_s11 + $0x8] sm:$0xff] }
 0x156   : > { %2115 = vmatmul.bf16.vlgmr.msra.gmra.mxu3 %v2773_v60  ;;  %v1468_v57 = vunpack.c.l.bf16 %v1452_v61  ;;  %v1230_v53 = vpack.c.bf16 %v1214_v6, %v1214_v6  ;;  %v1518_v59 = vunpack.c.l.bf16 %v1502_v20  ;;  %v1434_v43 = vmul.f32 0.796875, %v1418_v1 }
 0x157   : > { %v1435_v40 = vmul.f32 0.796875, %v1419_v7  ;;  %v1610_v56 = vpack.c.bf16 %v1601_v32, %v1600_v3  ;;  %v1519_v18 = vunpack.c.l.bf16 %v1503_v49  ;;  %v1469_v22 = vunpack.c.l.bf16 %v1453_v13 }
 0x158   : > { %2916 = vtanh.f32 %v1468_v57  ;;  %v1231_v14 = vpack.c.bf16 %v1215_v8, %v1215_v8  ;;  %v1534_v37 = vadd.f32 1.0, %v1518_v59  ;;  %v1450_v16 = vpack.c.bf16 %v1434_v43, %v1434_v43 }
 0x159   : > { %v1451_v31 = vpack.c.bf16 %v1435_v40, %v1435_v40  ;;  %2069 = vmatpush.bf16.msra.mxu0 %v1610_v56  ;;  %2834 = vmatpush.bf16.msra.mxu2 %v1610_v56  ;;  %v1535_v17 = vadd.f32 1.0, %v1519_v18  ;;  %v1213_v46 = vmul.f32 0.5, %v3491_v4  ;;  %v1228_v24 = vpack.c.bf16 %v1212_v19, %v1212_v19 }
 0x15a   : > { %2918 = vtanh.f32 %v1469_v22  ;;  %v1550_v27 = vpack.c.bf16 %v1534_v37, %v1534_v37  ;;  %v1466_v44 = vunpack.c.l.bf16 %v1450_v16  ;;  %v1400_v23 = vpack.c.bf16 %v3740_v9, %v3740_v9 }
 0x15b   : > { %v1467_v15 = vunpack.c.l.bf16 %v1451_v31  ;;  %v1383_v47 = vadd.f32 %v1367_v54, %v3677_v51  ;;  %v1551_v11 = vpack.c.bf16 %v1535_v17, %v1535_v17  ;;  %v1566_v12 = vunpack.c.l.bf16 %v1230_v53 }
 0x15c   : > { %v1401_v34 = vpack.c.bf16 %v3737_v63, %v3737_v63  ;;  %v1567_v36 = vunpack.c.l.bf16 %v1231_v14  ;;  %v1582_v58 = vunpack.c.l.bf16 %v1550_v27  ;;  %2920 = vtanh.f32 %v1466_v44 }
 0x15d   : > { %v1416_v50 = vunpack.c.l.bf16 %v1400_v23  ;;  %v1583_v55 = vunpack.c.l.bf16 %v1551_v11  ;;  %v1210_v6 = vmul.f32 0.5, %v3604_v25  ;;  %2922 = vtanh.f32 %v1467_v15 }
 0x15e   : > { %v2917_v4 = vpop.eup %2916  ;;  %v1417_v10 = vunpack.c.l.bf16 %v1401_v34  ;;  %v1229_v21 = vpack.c.bf16 %v1213_v46, %v1213_v46  ;;  %v1564_v9 = vunpack.c.l.bf16 %v1228_v24  ;;  %v1598_v33 = vmul.f32 %v1582_v58, %v1566_v12 }
 0x15f   : > { %v1500_v60 = vpack.c.bf16 %v2917_v4, %v2917_v4  ;;  %v1432_v35 = vmul.f32 0.796875, %v1416_v50  ;;  %v1599_v29 = vmul.f32 %v1583_v55, %v1567_v36  ;;  %v1211_v8 = vmul.f32 0.5, %v3501_v28 }
 0x160   : > { %v2919_v54 = vpop.eup %2918  ;;  %v1433_v63 = vmul.f32 0.796875, %v1417_v10  ;;  %v1398_v62 = vpack.c.bf16 %v3649_v5, %v3649_v5  ;;  %v1226_v25 = vpack.c.bf16 %v1210_v6, %v1210_v6  ;;  %v1399_v61 = vpack.c.bf16 %v1383_v47, %v1383_v47 }
 0x161   : > { %v1501_v45 = vpack.c.bf16 %v2919_v54, %v2919_v54  ;;  %v1516_v38 = vunpack.c.l.bf16 %v1500_v60  ;;  %v1448_v48 = vpack.c.bf16 %v1432_v35, %v1432_v35  ;;  %v1609_v19 = vpack.c.bf16 %v1599_v29, %v1598_v33 }
 0x162   : > { %v1449_v26 = vpack.c.bf16 %v1433_v63, %v1433_v63  ;;  %v2921_v3 = vpop.eup %2920  ;;  %v1414_v28 = vunpack.c.l.bf16 %v1398_v62  ;;  %v1227_v49 = vpack.c.bf16 %v1211_v8, %v1211_v8  ;;  %v1415_v5 = vunpack.c.l.bf16 %v1399_v61 }
 0x163   : > { %v1517_v20 = vunpack.c.l.bf16 %v1501_v45  ;;  %v1532_v1 = vadd.f32 1.0, %v1516_v38  ;;  %v1464_v7 = vunpack.c.l.bf16 %v1448_v48  ;;  %v2923_v32 = vpop.eup %2922  ;;  %2070 = vmatpush.bf16.msra.mxu0 %v1609_v19  ;;  %2835 = vmatpush.bf16.msra.mxu2 %v1609_v19  ;;  %v1498_v13 = vpack.c.bf16 %v2921_v3, %v2921_v3 }
 0x164   : > { %v1465_v57 = vunpack.c.l.bf16 %v1449_v26  ;;  %v1499_v43 = vpack.c.bf16 %v2923_v32, %v2923_v32  ;;  %v1430_v56 = vmul.f32 0.796875, %v1414_v28  ;;  %v1431_v18 = vmul.f32 0.796875, %v1415_v5 }
 0x165   : > { %v1533_v53 = vadd.f32 1.0, %v1517_v20  ;;  %v1548_v59 = vpack.c.bf16 %v1532_v1, %v1532_v1  ;;  %2924 = vtanh.f32 %v1464_v7  ;;  %v1514_v40 = vunpack.c.l.bf16 %v1498_v13 }
 0x166   : > { %2926 = vtanh.f32 %v1465_v57  ;;  %2120 = vmatmul.bf16.gmra.mxu3 %v2774_v42  ;;  %v1565_v14 = vunpack.c.l.bf16 %v1229_v21  ;;  %v1515_v16 = vunpack.c.l.bf16 %v1499_v43  ;;  %v1562_v17 = vunpack.c.l.bf16 %v1226_v25 }
 0x167   : > { %v1549_v22 = vpack.c.bf16 %v1533_v53, %v1533_v53  ;;  %v1580_v37 = vunpack.c.l.bf16 %v1548_v59  ;;  %v1530_v31 = vadd.f32 1.0, %v1514_v40  ;;  %v1446_v46 = vpack.c.bf16 %v1430_v56, %v1430_v56 }
 0x168   : > { %v1447_v24 = vpack.c.bf16 %v1431_v18, %v1431_v18  ;;  %v1531_v15 = vadd.f32 1.0, %v1515_v16  ;;  %v1563_v23 = vunpack.c.l.bf16 %v1227_v49  ;;  %v1208_v11 = vmul.f32 0.5, %v3625_v39 }
 0x169   : > { %v1581_v27 = vunpack.c.l.bf16 %v1549_v22  ;;  %v1596_v44 = vmul.f32 %v1580_v37, %v1564_v9  ;;  %v1546_v47 = vpack.c.bf16 %v1530_v31, %v1530_v31  ;;  %v1462_v12 = vunpack.c.l.bf16 %v1446_v46 }
 0x16a   : > { %v1463_v34 = vunpack.c.l.bf16 %v1447_v24  ;;  %v1547_v50 = vpack.c.bf16 %v1531_v15, %v1531_v15  ;;  %v1209_v4 = vmul.f32 0.5, %v3623_v0  ;;  %v1396_v55 = vpack.c.bf16 %v3793_v52, %v3793_v52 }
 0x16b   : > { %v2925_v36 = vpop.eup %2924  ;;  %v1597_v58 = vmul.f32 %v1581_v27, %v1565_v14  ;;  %v1578_v10 = vunpack.c.l.bf16 %v1546_v47  ;;  %2928 = vtanh.f32 %v1462_v12  ;;  %v1397_v60 = vpack.c.bf16 %v3673_v41, %v3673_v41 }
 0x16c   : > { %v2927_v6 = vpop.eup %2926  ;;  %v1496_v21 = vpack.c.bf16 %v2925_v36, %v2925_v36  ;;  %v1579_v35 = vunpack.c.l.bf16 %v1547_v50  ;;  %2930 = vtanh.f32 %v1463_v34  ;;  %v1412_v29 = vunpack.c.l.bf16 %v1396_v55  ;;  %v3935_v34 = vld [vmem:[#allocation8_spill] sm:$0xff] }
 0x16d   : > { %v1608_v9 = vpack.c.bf16 %v1597_v58, %v1596_v44  ;;  %v1497_v39 = vpack.c.bf16 %v2927_v6, %v2927_v6  ;;  %v1594_v54 = vmul.f32 %v1578_v10, %v1562_v17  ;;  %v1413_v8 = vunpack.c.l.bf16 %v1397_v60 }
 0x16e   : > { %v1512_v33 = vunpack.c.l.bf16 %v1496_v21  ;;  %v1595_v0 = vmul.f32 %v1579_v35, %v1563_v23  ;;  %v1224_v63 = vpack.c.bf16 %v1208_v11, %v1208_v11  ;;  %v1428_v38 = vmul.f32 0.796875, %v1412_v29 }
 0x16f   : > { %2071 = vmatpush.bf16.msra.mxu0 %v1608_v9  ;;  %2836 = vmatpush.bf16.msra.mxu2 %v1608_v9  ;;  %v1513_v52 = vunpack.c.l.bf16 %v1497_v39  ;;  %v1429_v48 = vmul.f32 0.796875, %v1413_v8  ;;  %v1225_v19 = vpack.c.bf16 %v1209_v4, %v1209_v4  ;;  %v1206_v61 = vmul.f32 0.5, %v3520_v30 }
 0x170   : > { %v1528_v45 = vadd.f32 1.0, %v1512_v33  ;;  %v1607_v62 = vpack.c.bf16 %v1595_v0, %v1594_v54  ;;  %v1444_v42 = vpack.c.bf16 %v1428_v38, %v1428_v38  ;;  %v1560_v7 = vunpack.c.l.bf16 %v1224_v63  ;;  %v2771_v63 = vld [vmem:[%s3913_s10] sm:$0xff] }
 0x171   : > { %v1529_v25 = vadd.f32 1.0, %v1513_v52  ;;  %v2929_v41 = vpop.eup %2928  ;;  %v1445_v3 = vpack.c.bf16 %v1429_v48, %v1429_v48  ;;  %v1207_v28 = vmul.f32 0.5, %v3677_v51  ;;  %v1561_v53 = vunpack.c.l.bf16 %v1225_v19  ;;  %v2772_v52 = vld [vmem:[%s3913_s10 + $0x8] sm:$0xff]  ;;  %v634_v48 = vpop.permute.xlu1 %633 }
 0x172   : > { %v1544_v26 = vpack.c.bf16 %v1528_v45, %v1528_v45  ;;  %v2931_v20 = vpop.eup %2930  ;;  %v1494_v32 = vpack.c.bf16 %v2929_v41, %v2929_v41  ;;  %v1460_v57 = vunpack.c.l.bf16 %v1444_v42  ;;  %v1222_v22 = vpack.c.bf16 %v1206_v61, %v1206_v61  ;;  %v629_v45 = vpop.permute.xlu0 %628  ;;  %v3937_v41 = vld [vmem:[#allocation5_spill] sm:$0xff]  ;;  %v3938_v61 = vld [vmem:[#allocation7_spill] sm:$0xff] }
 0x173   : > { %2072 = vmatpush.bf16.msra.mxu0 %v1607_v62  ;;  %2837 = vmatpush.bf16.msra.mxu2 %v1607_v62  ;;  %v1545_v1 = vpack.c.bf16 %v1529_v25, %v1529_v25  ;;  %v1495_v13 = vpack.c.bf16 %v2931_v20, %v2931_v20  ;;  %v1461_v5 = vunpack.c.l.bf16 %v1445_v3  ;;  %v1223_v14 = vpack.c.bf16 %v1207_v28, %v1207_v28  ;;  %v3936_v62 = vld [vmem:[#allocation6_spill] sm:$0xff]  ;;  %v619_v25 = vpop.permute.xlu2 %618  ;;  %v3939_v3 = vld [vmem:[#allocation4_spill] sm:$0xff] }
 0x174   : > { %v1576_v49 = vunpack.c.l.bf16 %v1544_v26  ;;  %v1510_v43 = vunpack.c.l.bf16 %v1494_v32  ;;  %2932 = vtanh.f32 %v1460_v57  ;;  %v1558_v24 = vunpack.c.l.bf16 %v1222_v22 }
 0x175   : > { %v1577_v59 = vunpack.c.l.bf16 %v1545_v1  ;;  %v1511_v56 = vunpack.c.l.bf16 %v1495_v13  ;;  %2934 = vtanh.f32 %v1461_v5  ;;  %v1559_v27 = vunpack.c.l.bf16 %v1223_v14 }
 0x176   : > { %v1592_v40 = vmul.f32 %v1576_v49, %v1560_v7  ;;  %v1526_v18 = vadd.f32 1.0, %v1510_v43  ;;  %v1204_v23 = vmul.f32 0.5, %v3675_v2  ;;  %v1205_v36 = vmul.f32 0.5, %v3935_v34 }
 0x177   : > { %v1593_v30 = vmul.f32 %v1577_v59, %v1561_v53  ;;  %v1527_v37 = vadd.f32 1.0, %v1511_v56  ;;  %v674_v19 = vadd.f32 %v3936_v62, %v629_v45  ;;  %v676_v42 = vadd.f32 %v3938_v61, %v634_v48  ;;  %v2775_v48 = vld [vmem:[%s3915_s12] sm:$0xff]  ;;  %v2776_v62 = vld [vmem:[%s3915_s12 + $0x8] sm:$0xff] }
 0x178   : > { %v1542_v31 = vpack.c.bf16 %v1526_v18, %v1526_v18  ;;  %v1220_v6 = vpack.c.bf16 %v1204_v23, %v1204_v23  ;;  %v1221_v21 = vpack.c.bf16 %v1205_v36, %v1205_v36  ;;  %v669_v20 = vadd.f32 %v3939_v3, %v619_v25 }
 0x179   : > { %v1606_v16 = vpack.c.bf16 %v1593_v30, %v1592_v40  ;;  %v1543_v51 = vpack.c.bf16 %v1527_v37, %v1527_v37  ;;  %v684_v1 = vmul.f32 0.044715, %v674_v19  ;;  %v685_v28 = vmul.f32 0.044715, %v676_v42 }
 0x17a   : > { %v1574_v17 = vunpack.c.l.bf16 %v1542_v31  ;;  %v2933_v46 = vpop.eup %2932  ;;  %v1556_v39 = vunpack.c.l.bf16 %v1220_v6  ;;  %v1557_v2 = vunpack.c.l.bf16 %v1221_v21  ;;  %v624_v38 = vpop.permute.xlu0 %623  ;;  %v682_v32 = vmul.f32 0.044715, %v669_v20 }
 0x17b   : > { %2073 = vmatpush.bf16.msra.mxu0 %v1606_v16  ;;  %2838 = vmatpush.bf16.msra.mxu2 %v1606_v16  ;;  %v1575_v44 = vunpack.c.l.bf16 %v1543_v51  ;;  %v2935_v15 = vpop.eup %2934  ;;  %v1492_v47 = vpack.c.bf16 %v2933_v46, %v2933_v46  ;;  %v671_v26 = vadd.f32 %v3937_v41, %v624_v38  ;;  %v688_v49 = vmul.f32 %v684_v1, %v674_v19 }
 0x17c   : > { %v1590_v11 = vmul.f32 %v1574_v17, %v1558_v24  ;;  %v1493_v58 = vpack.c.bf16 %v2935_v15, %v2935_v15  ;;  %v689_v57 = vmul.f32 %v685_v28, %v676_v42  ;;  %v686_v53 = vmul.f32 %v682_v32, %v669_v20 }
 0x17d   : > { %v1591_v12 = vmul.f32 %v1575_v44, %v1559_v27  ;;  %v1508_v50 = vunpack.c.l.bf16 %v1492_v47  ;;  %v683_v7 = vmul.f32 0.044715, %v671_v26  ;;  %v692_v59 = vmul.f32 %v688_v49, %v674_v19 }
 0x17e   : > { %v1509_v55 = vunpack.c.l.bf16 %v1493_v58  ;;  %v693_v40 = vmul.f32 %v689_v57, %v676_v42  ;;  %v690_v56 = vmul.f32 %v686_v53, %v669_v20 }
 0x17f   : > { %v1605_v4 = vpack.c.bf16 %v1591_v12, %v1590_v11  ;;  %v1524_v10 = vadd.f32 1.0, %v1508_v50  ;;  %v687_v13 = vmul.f32 %v683_v7, %v671_v26  ;;  %v696_v30 = vadd.f32 %v692_v59, %v674_v19  ;;  %v2158_v59 = vpop.permute.xlu2 %2157 }
 0x180   : > { %v1525_v60 = vadd.f32 1.0, %v1509_v55  ;;  %v697_v22 = vadd.f32 %v693_v40, %v676_v42  ;;  %v694_v14 = vadd.f32 %v690_v56, %v669_v20  ;;  %v680_v12 = vmul.f32 0.5, %v674_v19  ;;  %v2153_v19 = vpop.permute.xlu1 %2152 }
 0x181   : > { %2074 = vmatpush.bf16.msra.mxu0 %v1605_v4  ;;  %2839 = vmatpush.bf16.msra.mxu2 %v1605_v4  ;;  %v1540_v9 = vpack.c.bf16 %v1524_v10, %v1524_v10  ;;  %v691_v43 = vmul.f32 %v687_v13, %v671_v26  ;;  %v700_v37 = vmul.f32 0.7978846, %v696_v30  ;;  %v679_v4 = vmul.f32 0.5, %v671_v26 }
 0x182   : > { %v1541_v35 = vpack.c.bf16 %v1525_v60, %v1525_v60  ;;  %v701_v51 = vmul.f32 0.7978846, %v697_v22  ;;  %v698_v17 = vmul.f32 0.7978846, %v694_v14  ;;  %v681_v55 = vmul.f32 0.5, %v676_v42  ;;  %v2143_v61 = vpop.permute.xlu0 %2142 }
 0x183   : > { %v1572_v54 = vunpack.c.l.bf16 %v1540_v9  ;;  %v695_v18 = vadd.f32 %v691_v43, %v671_v26  ;;  %2936 = vtanh.f32 %v700_v37  ;;  %v678_v10 = vmul.f32 0.5, %v669_v20 }
 0x184   : > { %v1573_v33 = vunpack.c.l.bf16 %v1541_v35 }
 0x185   : > { %v1588_v29 = vmul.f32 %v1572_v54, %v1556_v39  ;;  %v699_v16 = vmul.f32 0.7978846, %v695_v18 }
 0x186   : > { %v1589_v8 = vmul.f32 %v1573_v33, %v1557_v2 }
 0x187   : > { %2938 = vtanh.f32 %v699_v16 }
 0x188   : > { %v1604_v0 = vpack.c.bf16 %v1589_v8, %v1588_v29  ;;  %2940 = vtanh.f32 %v701_v51  ;;  %v2148_v26 = vpop.permute.xlu1 %2147 }
 0x189   : > { %2942 = vtanh.f32 %v698_v17  ;;  %v2937_v24 = vpop.eup %2936 }
 0x18a   : > { %2075 = vmatpush.bf16.msra.mxu0 %v1604_v0  ;;  %2840 = vmatpush.bf16.msra.mxu2 %v1604_v0  ;;  %v708_v47 = vadd.f32 1.0, %v2937_v24 }
 0x18c   : > { %v712_v50 = vmul.f32 %v708_v47, %v680_v12 }
 0x18d   : > { %2076 = vmatmul.bf16.vlgmr.msra.gmra.mxu0 %v2771_v63  ;;  %2081 = vmatmul.bf16.vlgmr.msra.gmra.mxu2 %v2772_v52  ;;  %v2939_v27 = vpop.eup %2938 }
 0x18e   : > { %v2941_v44 = vpop.eup %2940  ;;  %v707_v34 = vadd.f32 1.0, %v2939_v27 }
 0x18f   : > { %v2943_v11 = vpop.eup %2942  ;;  %v709_v36 = vadd.f32 1.0, %v2941_v44 }
 0x190   : > { %v706_v58 = vadd.f32 1.0, %v2943_v11  ;;  %v711_v60 = vmul.f32 %v707_v34, %v679_v4 }
 0x191   : > { %v713_v9 = vmul.f32 %v709_v36, %v681_v55 }
 0x192   : > { %v710_v39 = vmul.f32 %v706_v58, %v678_v10 }
 0x1d9   : > { %v2116_v5 = vpop.f32.mrf.mxu3 }
 0x1e1   : > { %v2118_v31 = vpop.f32.mrf.mxu3 }
 0x1e9   : > { %v2121_v15 = vpop.f32.mrf.mxu3 }
 0x1f1   : > { %v2123_v33 = vpop.f32.mrf.mxu3 }
 0x20a   : > { %v2077_v46 = vpop.f32.mrf.mxu0 }
 0x20b   : > { %v2087_v29 = vadd.f32 %v2077_v46, %v710_v39  ;;  %v2781_v39 = vld [vmem:[%s3916_s13 + $0x20] sm:$0xff] }
 0x20d   : > { %v2126_v45 = vadd.f32 %v2116_v5, %v2087_v29  ;;  %v2783_v29 = vld [vmem:[%s3916_s13 + $0x30] sm:$0xff] }
 0x210   : > { %v2082_v23 = vpop.f32.mrf.mxu2 }
 0x211   : > { %v2089_v21 = vadd.f32 %v2082_v23, %v712_v50 }
 0x212   : > { %v2079_v6 = vpop.f32.mrf.mxu0 }
 0x213   : > { %v2088_v54 = vadd.f32 %v2079_v6, %v711_v60  ;;  %v2128_v8 = vadd.f32 %v2121_v15, %v2089_v21 }
 0x215   : > { %v2127_v63 = vadd.f32 %v2118_v31, %v2088_v54  ;;  %v2778_v54 = vld [vmem:[%s3916_s13 + $0x8] sm:$0xff] }
 0x217   : > { %v2134_v38 = vpack.c.bf16 %v2127_v63, %v2126_v45  ;;  %v2269_v63 = vpop.permute.xlu2 %2268  ;;  %v2279_v45 = vpop.permute.xlu1 %2278 }
 0x218   : > { %v2084_v35 = vpop.f32.mrf.mxu2 }
 0x219   : > { %v2090_v2 = vadd.f32 %v2084_v35, %v713_v9  ;;  %v2777_v35 = vld [vmem:[%s3916_s13] sm:$0xff] }
 0x21b   : > { %v2129_v0 = vadd.f32 %v2123_v33, %v2090_v2  ;;  %v2782_v2 = vld [vmem:[%s3916_s13 + $0x28] sm:$0xff]  ;;  %v2779_v33 = vld [vmem:[%s3916_s13 + $0x10] sm:$0xff] }
 0x21d   : > { %v2135_v52 = vpack.c.bf16 %v2129_v0, %v2128_v8  ;;  %v2780_v8 = vld [vmem:[%s3916_s13 + $0x18] sm:$0xff] }
 0x21e   : > { %v2784_v0 = vld [vmem:[%s3916_s13 + $0x38] sm:$0xff] }
 0x21f   : > { %2183 = vmatpush.bf16.msrb.mxu0 %v2135_v52  ;;  %v2284_v52 = vpop.permute.xlu2 %2283 }
 0x223   : > { %2184 = vmatpush.bf16.msrb.mxu0 %v2134_v38  ;;  %v2274_v38 = vpop.permute.xlu0 %2273 }
 0x226   : > { %2711 = vmatmul.msk.bf16.vlgmr.msrb.gmra.mxu0 %vm2170_vm1, %v2775_v48 }
 0x227   : > { %v2299_v48 = vpop.permute.xlu2 %2298 }
 0x236   : > { %2712 = vmatmul.msk.bf16.gmra.mxu0 %vm2170_vm1, %v2776_v62  ;;  %v2294_v62 = vpop.permute.xlu1 %2293 }
 0x2a3   : > { %v2186_v25 = vpop.f32.mrf.mxu0 }
 0x2a4   : > { %v2187_v3 = vadd.f32 %v2186_v25, %v2143_v61  ;;  %v2309_v61 = vpop.permute.xlu1 %2308 }
 0x2a6   : > { %v2200_v1 = vmul.f32 0.044715, %v2187_v3  ;;  %v2196_v10 = vmul.f32 0.5, %v2187_v3 }
 0x2a8   : > { %v2204_v13 = vmul.f32 %v2200_v1, %v2187_v3 }
 0x2aa   : > { %v2208_v40 = vmul.f32 %v2204_v13, %v2187_v3 }
 0x2ab   : > { %v2188_v41 = vpop.f32.mrf.mxu0 }
 0x2ac   : > { %v2189_v42 = vadd.f32 %v2188_v41, %v2148_v26  ;;  %v2212_v14 = vadd.f32 %v2208_v40, %v2187_v3  ;;  %v2289_v41 = vpop.permute.xlu0 %2288  ;;  %v2314_v26 = vpop.permute.xlu2 %2313 }
 0x2ae   : > { %v2201_v20 = vmul.f32 0.044715, %v2189_v42  ;;  %v2216_v17 = vmul.f32 0.7978846, %v2212_v14  ;;  %v2197_v4 = vmul.f32 0.5, %v2189_v42 }
 0x2b0   : > { %v2205_v49 = vmul.f32 %v2201_v20, %v2189_v42 }
 0x2b2   : > { %v2209_v53 = vmul.f32 %v2205_v49, %v2189_v42 }
 0x2b3   : > { %v2191_v7 = vpop.f32.mrf.mxu0 }
 0x2b4   : > { %v2192_v28 = vadd.f32 %v2191_v7, %v2153_v19  ;;  %v2213_v22 = vadd.f32 %v2209_v53, %v2189_v42  ;;  %v2304_v13 = vpop.permute.xlu0 %2303  ;;  %v2324_v53 = vpop.permute.xlu1 %2323 }
 0x2b6   : > { %v2202_v32 = vmul.f32 0.044715, %v2192_v28  ;;  %v2217_v51 = vmul.f32 0.7978846, %v2213_v22  ;;  %v2198_v11 = vmul.f32 0.5, %v2192_v28 }
 0x2b8   : > { %v2206_v57 = vmul.f32 %v2202_v32, %v2192_v28 }
 0x2ba   : > { %v2210_v5 = vmul.f32 %v2206_v57, %v2192_v28 }
 0x2bb   : > { %v2193_v43 = vpop.f32.mrf.mxu0 }
 0x2bc   : > { %v2194_v56 = vadd.f32 %v2193_v43, %v2158_v59  ;;  %v2214_v30 = vadd.f32 %v2210_v5, %v2192_v28  ;;  %v2319_v59 = vpop.permute.xlu0 %2318 }
 0x2be   : > { %v2203_v18 = vmul.f32 0.044715, %v2194_v56  ;;  %v2218_v16 = vmul.f32 0.7978846, %v2214_v30  ;;  %v2199_v12 = vmul.f32 0.5, %v2194_v56 }
 0x2c0   : > { %v2207_v37 = vmul.f32 %v2203_v18, %v2194_v56  ;;  %2944 = vtanh.f32 %v2218_v16 }
 0x2c1   : > { %2946 = vtanh.f32 %v2217_v51  ;;  %v2329_v51 = vpop.permute.xlu2 %2328 }
 0x2c2   : > { %v2211_v31 = vmul.f32 %v2207_v37, %v2194_v56  ;;  %2948 = vtanh.f32 %v2216_v17 }
 0x2c4   : > { %v2215_v46 = vadd.f32 %v2211_v31, %v2194_v56  ;;  %v2334_v17 = vpop.permute.xlu0 %2333 }
 0x2c6   : > { %v2219_v24 = vmul.f32 0.7978846, %v2215_v46  ;;  %v2945_v27 = vpop.eup %2944 }
 0x2c7   : > { %v2947_v44 = vpop.eup %2946  ;;  %v2226_v23 = vadd.f32 1.0, %v2945_v27 }
 0x2c8   : > { %2950 = vtanh.f32 %v2219_v24  ;;  %v2949_v15 = vpop.eup %2948  ;;  %v2225_v36 = vadd.f32 1.0, %v2947_v44 }
 0x2c9   : > { %v2230_v58 = vmul.f32 %v2226_v23, %v2198_v11  ;;  %v2224_v55 = vadd.f32 1.0, %v2949_v15 }
 0x2ca   : > { %v2229_v21 = vmul.f32 %v2225_v36, %v2197_v4  ;;  %v2344_v36 = vpop.permute.xlu2 %2343 }
 0x2cb   : > { %v2228_v60 = vmul.f32 %v2224_v55, %v2196_v10 }
 0x2cd   : > { %v2248_v9 = vpack.c.bf16 %v2229_v21, %v2228_v60 }
 0x2ce   : > { %v2951_v47 = vpop.eup %2950 }
 0x2cf   : > { %v2227_v34 = vadd.f32 1.0, %v2951_v47 }
 0x2d1   : > { %v2231_v50 = vmul.f32 %v2227_v34, %v2199_v12 }
 0x2d3   : > { %v2249_v6 = vpack.c.bf16 %v2231_v50, %v2230_v58  ;;  %v2339_v58 = vpop.permute.xlu1 %2338 }
 0x2d5   : > { %2416 = vmatpush.bf16.msrb.mxu2 %v2249_v6  ;;  %2841 = vmatpush.bf16.msrb.mxu3 %v2249_v6 }
 0x2d9   : > { %2417 = vmatpush.bf16.msrb.mxu2 %v2248_v9  ;;  %2842 = vmatpush.bf16.msrb.mxu3 %v2248_v9 }
 0x2dc   : > { %2745 = vmatmul.msk.bf16.vlgmr.msrb.gmra.mxu2 %vm2170_vm1, %v2777_v35  ;;  %2749 = vmatmul.msk.bf16.vlgmr.msrb.gmra.mxu3 %vm2170_vm1, %v2781_v39 }
 0x2ec   : > { %2746 = vmatmul.msk.bf16.gmra.mxu2 %vm2170_vm1, %v2778_v54  ;;  %2750 = vmatmul.msk.bf16.gmra.mxu3 %vm2170_vm1, %v2782_v2 }
 0x2fc   : > { %2747 = vmatmul.msk.bf16.gmra.mxu2 %vm2170_vm1, %v2779_v33  ;;  %2751 = vmatmul.msk.bf16.gmra.mxu3 %vm2170_vm1, %v2783_v29 }
 0x30c   : > { %2748 = vmatmul.msk.bf16.gmra.mxu2 %vm2170_vm1, %v2780_v8  ;;  %2752 = vmatmul.msk.bf16.gmra.mxu3 %vm2170_vm1, %v2784_v0 }
 0x35f   : > { %v2419_v19 = vpop.f32.mrf.mxu2  ;;  %v2439_v25 = vpop.f32.mrf.mxu3 }
 0x360   : > { %v2420_v20 = vadd.f32 %v2419_v19, %v2269_v63  ;;  %v2440_v1 = vadd.f32 %v2439_v25, %v2309_v61 }
 0x367   : > { %v2421_v42 = vpop.f32.mrf.mxu2  ;;  %v2441_v3 = vpop.f32.mrf.mxu3 }
 0x368   : > { %v2422_v7 = vadd.f32 %v2421_v42, %v2274_v38  ;;  %v2442_v28 = vadd.f32 %v2441_v3, %v2314_v26 }
 0x36a   : > { %v2788_v32 = vpack.c.bf16 %v2422_v7, %v2420_v20  ;;  %v2808_v49 = vpack.c.bf16 %v2442_v28, %v2440_v1 }
 0x36c   : > { %2789 = vst [vmem:[%s3884_s27] sm:$0xff] %v2788_v32  }
 0x36d   : > { %2828 = vst [vmem:[%s3884_s27 + $0x20] sm:$0xff] %v2808_v49  }
 0x36f   : > { %v2424_v57 = vpop.f32.mrf.mxu2  ;;  %v2444_v5 = vpop.f32.mrf.mxu3 }
 0x370   : > { %v2425_v56 = vadd.f32 %v2424_v57, %v2279_v45  ;;  %v2445_v30 = vadd.f32 %v2444_v5, %v2319_v59 }
 0x377   : > { %v2426_v43 = vpop.f32.mrf.mxu2  ;;  %v2446_v40 = vpop.f32.mrf.mxu3 }
 0x378   : > { %v2427_v18 = vadd.f32 %v2426_v43, %v2284_v52  ;;  %v2447_v22 = vadd.f32 %v2446_v40, %v2324_v53 }
 0x37a   : > { %v2793_v14 = vpack.c.bf16 %v2427_v18, %v2425_v56  ;;  %v2813_v37 = vpack.c.bf16 %v2447_v22, %v2445_v30 }
 0x37c   : > { %2825 = vst [vmem:[%s3884_s27 + $0x8] sm:$0xff] %v2793_v14  }
 0x37d   : > { %2829 = vst [vmem:[%s3884_s27 + $0x28] sm:$0xff] %v2813_v37  }
 0x37f   : > { %v2429_v16 = vpop.f32.mrf.mxu2  ;;  %v2449_v31 = vpop.f32.mrf.mxu3 }
 0x380   : > { %v2430_v27 = vadd.f32 %v2429_v16, %v2289_v41  ;;  %v2450_v44 = vadd.f32 %v2449_v31, %v2329_v51 }
 0x387   : > { %v2431_v46 = vpop.f32.mrf.mxu2  ;;  %v2451_v24 = vpop.f32.mrf.mxu3 }
 0x388   : > { %v2432_v15 = vadd.f32 %v2431_v46, %v2294_v62  ;;  %v2452_v23 = vadd.f32 %v2451_v24, %v2334_v17 }
 0x38a   : > { %v2798_v47 = vpack.c.bf16 %v2432_v15, %v2430_v27  ;;  %v2818_v11 = vpack.c.bf16 %v2452_v23, %v2450_v44 }
 0x38c   : > { %2826 = vst [vmem:[%s3884_s27 + $0x10] sm:$0xff] %v2798_v47  }
 0x38d   : > { %2830 = vst [vmem:[%s3884_s27 + $0x30] sm:$0xff] %v2818_v11  }
 0x38f   : > { %v2434_v12 = vpop.f32.mrf.mxu2  ;;  %v2454_v34 = vpop.f32.mrf.mxu3 }
 0x390   : > { %v2435_v55 = vadd.f32 %v2434_v12, %v2299_v48  ;;  %v2455_v6 = vadd.f32 %v2454_v34, %v2339_v58 }
 0x397   : > { %v2436_v50 = vpop.f32.mrf.mxu2  ;;  %v2456_v4 = vpop.f32.mrf.mxu3 }
 0x398   : > { %v2437_v10 = vadd.f32 %v2436_v50, %v2304_v13  ;;  %v2457_v21 = vadd.f32 %v2456_v4, %v2344_v36 }
 0x39a   : > { %v2803_v60 = vpack.c.bf16 %v2437_v10, %v2435_v55  ;;  %v2823_v9 = vpack.c.bf16 %v2457_v21, %v2455_v6 }
 0x39c   : > { %2827 = vst [vmem:[%s3884_s27 + $0x18] sm:$0xff] %v2803_v60  }
 0x39d   : > { %2831 = vst [vmem:[%s3884_s27 + $0x38] sm:$0xff] %v2823_v9  }
 0x39e PF: > { %s25_s20 = sadd.s32 1, %s2974_s20   ;;  %s3940_s18 = sld [smem:[#allocation2_spill]] }
 0x39f   : > { %p22_p5 = scmp.ge.s32.totalorder %s25_s20, 4   ;;  %s3941_s19 = sld [smem:[#allocation3_spill]] }
 0x3a1   :  { %24 = sbr.rel (!%p22_p5) target bundleno = 2 (0x2), region = 119 }

</bundles_post_ra>
